<compile_context>
chip_gen: v5e
topology: v5e:2x2
jax: 0.10.0
libtpu: 0.0.40
codegen_flags: <defaults>
</compile_context>

<pallas_src>
import functools

import jax
import jax.numpy as jnp
from jax import lax
from jax.experimental import pallas as pl
from jax.experimental.pallas import tpu as pltpu

LRELU_SLOPE = 0.1


def get_padding(kernel_size, dilation=1):
    return int((kernel_size * dilation - dilation) / 2)


def _round_up(x, m):
    return ((x + m - 1) // m) * m


def _cdiv(a, b):
    return -(-a // b)


# ----------------------------------------------------------------------------
# Pallas kernels
# ----------------------------------------------------------------------------
_MATMUL_VMEM_BUDGET = 24 * 1024 * 1024  # stay under the 32 MiB scoped default (v6e/v7x)


def _matmul_kernel(a_ref, b_ref, bias_ref, o_ref, acc_ref, *, act_in, act_out):
    """Tiled GEMM with f32 accumulator and fused bias / LeakyReLU prologue+epilogue."""
    @pl.when(pl.program_id(1) == 0)
    def _():
        acc_ref[...] = jnp.zeros_like(acc_ref)

    a = a_ref[...]                                   # f32 tile from HBM
    if act_in == "lrelu":                            # fused input activation (free VPU work)
        a = jnp.where(a >= 0, a, LRELU_SLOPE * a)
    acc_ref[...] += jnp.dot(a.astype(jnp.bfloat16), b_ref[...],
                            preferred_element_type=jnp.float32)

    @pl.when(pl.program_id(1) == pl.num_programs(1) - 1)
    def _():
        y = acc_ref[...] + bias_ref[...]             # fused bias epilogue
        if act_out == "lrelu":                       # fused output activation epilogue
            y = jnp.where(y >= 0, y, LRELU_SLOPE * y)
        o_ref[...] = y


def _plan_matmul(M, K, N):
    """Pick (tm, nm, tk, nk, Np) such that the double-buffered working set fits VMEM."""
    Np = _round_up(N, 128)
    plan = None
    for cap_m, cap_k in ((512, 1024), (256, 512), (128, 256), (64, 128)):
        nm = _cdiv(_round_up(M, 16), cap_m)
        tm = min(cap_m, _round_up(_cdiv(M, nm), 16))
        nk = _cdiv(_round_up(K, 128), cap_k)
        tk = min(cap_k, _round_up(_cdiv(K, nk), 128))
        # 2x (f32 A tile + bf16 B tile + f32 out tile) + f32 accumulator
        vmem = 2 * (tm * tk * 4 + tk * Np * 2 + tm * Np * 4) + tm * Np * 4
        plan = (tm, nm, tk, nk, Np)
        if vmem <= _MATMUL_VMEM_BUDGET:
            break
    return plan


@functools.partial(jax.jit, static_argnames=("act_in", "act_out"))
def pallas_matmul(a, b, bias=None, act_in=None, act_out=None):
    """(M,K) @ (K,N) (+bias, +optional LeakyReLU on input and/or output).

    A stays f32 in HBM and is cast to bf16 on-chip (no extra HBM pass); B is bf16;
    accumulation is f32 on the MXU."""
    a = a.astype(jnp.float32)
    b = b.astype(jnp.bfloat16)
    M, K = a.shape
    K2, N = b.shape
    assert K == K2
    tm, nm, tk, nk, Np = _plan_matmul(M, K, N)
    Mp, Kp = tm * nm, tk * nk
    a_p = jnp.pad(a, ((0, Mp - M), (0, Kp - K)))
    b_p = jnp.pad(b, ((0, Kp - K), (0, Np - N)))
    if bias is None:
        bias_p = jnp.zeros((1, Np), jnp.float32)
    else:
        bias_p = jnp.pad(bias.astype(jnp.float32).reshape(1, N), ((0, 0), (0, Np - N)))
    kernel = functools.partial(_matmul_kernel, act_in=act_in, act_out=act_out)
    out = pl.pallas_call(
        kernel,
        out_shape=jax.ShapeDtypeStruct((Mp, Np), jnp.float32),
        grid=(nm, nk),
        in_specs=[pl.BlockSpec((tm, tk), lambda i, k: (i, k)),
                  pl.BlockSpec((tk, Np), lambda i, k: (k, 0)),
                  pl.BlockSpec((1, Np), lambda i, k: (0, 0))],
        out_specs=pl.BlockSpec((tm, Np), lambda i, k: (i, 0)),
        scratch_shapes=[pltpu.VMEM((tm, Np), jnp.float32)],
        compiler_params=pltpu.CompilerParams(
            dimension_semantics=("parallel", "arbitrary"),
            vmem_limit_bytes=32 * 1024 * 1024),
    )(a_p, b_p, bias_p)
    return out[:M, :N]


def _groupnorm_kernel(*refs, add_residual, out_scale, act_out, eps):
    """GroupNorm(num_groups=1) over one batch element with fused residual / scale / lrelu."""
    if add_residual:
        x_ref, r_ref, g_ref, b_ref, o_ref = refs
    else:
        x_ref, g_ref, b_ref, o_ref = refs
        r_ref = None
    x = x_ref[...]                                   # (1, C, T, F)
    if add_residual:
        x = x + r_ref[...]                           # fused xs + r accumulate
    mean = jnp.mean(x)                               # single-pass statistics
    var = jnp.mean(x * x) - mean * mean
    inv = lax.rsqrt(var + eps)
    y = ((x - mean) * inv * g_ref[...] + b_ref[...]) * out_scale
    if act_out == "lrelu":
        y = jnp.where(y >= 0, y, LRELU_SLOPE * y)
    o_ref[...] = y


@functools.partial(jax.jit, static_argnames=("out_scale", "act_out"))
def pallas_groupnorm(x, gamma, beta, residual=None, out_scale=1.0, act_out=None):
    bs, C, T, Fr = x.shape
    g = gamma.reshape(1, C, 1, 1).astype(jnp.float32)
    b = beta.reshape(1, C, 1, 1).astype(jnp.float32)
    add_res = residual is not None
    xspec = pl.BlockSpec((1, C, T, Fr), lambda i: (i, 0, 0, 0))
    pspec = pl.BlockSpec((1, C, 1, 1), lambda i: (0, 0, 0, 0))
    in_specs = [xspec] + ([xspec] if add_res else []) + [pspec, pspec]
    args = [x.astype(jnp.float32)] + ([residual.astype(jnp.float32)] if add_res else []) + [g, b]
    # Module uses nn.GroupNorm(1, C, eps=1e-06) -> keep eps = 1e-6.
    kernel = functools.partial(_groupnorm_kernel, add_residual=add_res,
                               out_scale=float(out_scale), act_out=act_out, eps=1e-6)
    return pl.pallas_call(
        kernel,
        out_shape=jax.ShapeDtypeStruct((bs, C, T, Fr), jnp.float32),
        grid=(bs,),
        in_specs=in_specs,
        out_specs=xspec,
        compiler_params=pltpu.CompilerParams(dimension_semantics=("parallel",)),
    )(*args)


def _lstm_kernel(xp_ref, whh_ref, o_ref, h_scr, c_scr):
    """Both LSTM directions in one kernel; k timesteps unrolled per grid step.

    xp_ref : (k, 2, Bp, 4*Hp) f32   precomputed W_ih x + b_ih + b_hh, gate-major, padded
    whh_ref: (2, Hp, 4*Hp)    bf16  recurrent weights (all 4 gates fused in one GEMM)
    o_ref  : (k, 2, Bp, Hp)   f32   hidden states
    """
    @pl.when(pl.program_id(0) == 0)
    def _():
        h_scr[...] = jnp.zeros_like(h_scr)
        c_scr[...] = jnp.zeros_like(c_scr)

    hp = h_scr.shape[-1]
    whh = whh_ref[...]
    for u in range(xp_ref.shape[0]):                 # short static unroll
        h = h_scr[...]                               # (2, Bp, Hp) f32
        z = xp_ref[u] + jnp.einsum("dbh,dhg->dbg", h.astype(jnp.bfloat16), whh,
                                   preferred_element_type=jnp.float32)
        # PyTorch gate order: i, f, g, o -- contiguous on the lane axis.
        i_g = jax.nn.sigmoid(z[..., 0 * hp:1 * hp])
        f_g = jax.nn.sigmoid(z[..., 1 * hp:2 * hp])
        g_g = jnp.tanh(z[..., 2 * hp:3 * hp])
        o_g = jax.nn.sigmoid(z[..., 3 * hp:4 * hp])
        c = f_g * c_scr[...] + i_g * g_g
        h_new = o_g * jnp.tanh(c)
        c_scr[...] = c
        h_scr[...] = h_new
        o_ref[u] = h_new


@functools.partial(jax.jit, static_argnames=("k_unroll",))
def pallas_lstm_scan(xp, whh, k_unroll=4):
    """xp: (Tp, 2, Bp, 4Hp) f32; whh: (2, Hp, 4Hp) bf16 -> (Tp, 2, Bp, Hp) hidden states."""
    Tp, _, Bp, G = xp.shape
    Hp = G // 4
    return pl.pallas_call(
        _lstm_kernel,
        out_shape=jax.ShapeDtypeStruct((Tp, 2, Bp, Hp), jnp.float32),
        grid=(Tp // k_unroll,),
        in_specs=[pl.BlockSpec((k_unroll, 2, Bp, G), lambda t: (t, 0, 0, 0)),
                  pl.BlockSpec((2, Hp, G), lambda t: (0, 0, 0))],
        out_specs=pl.BlockSpec((k_unroll, 2, Bp, Hp), lambda t: (t, 0, 0, 0)),
        scratch_shapes=[pltpu.VMEM((2, Bp, Hp), jnp.float32),
                        pltpu.VMEM((2, Bp, Hp), jnp.float32)],
        # h/c scratch carry across time steps => must stay sequential ("arbitrary").
        compiler_params=pltpu.CompilerParams(dimension_semantics=("arbitrary",)),
    )(xp.astype(jnp.float32), whh.astype(jnp.bfloat16))


# ----------------------------------------------------------------------------
# Building blocks on top of the kernels (glue = reshapes / permutes / im2col)
# ----------------------------------------------------------------------------
def conv2d(x, weight, bias, stride=(1, 1), padding=(0, 0), dilation=(1, 1),
           act_in=None, act_out=None):
    """NCHW conv = im2col (glue) + Pallas GEMM with fused bias / activations.
    1x1 convolutions skip im2col entirely."""
    Cout, Cin, kh, kw = weight.shape
    x = x.astype(jnp.float32)
    if (kh, kw) == (1, 1) and tuple(stride) == (1, 1) and tuple(padding) == (0, 0) \
            and tuple(dilation) == (1, 1):
        N, C, H, W = x.shape
        pm = x.transpose(0, 2, 3, 1).reshape(N * H * W, C)
        out = pallas_matmul(pm, weight.reshape(Cout, Cin).T, bias=bias,
                            act_in=act_in, act_out=act_out)
        return out.reshape(N, H, W, Cout).transpose(0, 3, 1, 2)

    # TODO(synk): build im2col patches in VMEM inside a dedicated Pallas conv kernel to
    # avoid materializing the kh*kw-expanded patch tensor in HBM.
    patches = lax.conv_general_dilated_patches(
        x, (kh, kw), tuple(stride),
        padding=[(padding[0], padding[0]), (padding[1], padding[1])],
        rhs_dilation=tuple(dilation),
        dimension_numbers=('NCHW', 'OIHW', 'NCHW'))          # (N, Cin*kh*kw, Ho, Wo)
    N, K, Ho, Wo = patches.shape
    pm = patches.transpose(0, 2, 3, 1).reshape(N * Ho * Wo, K)
    wm = weight.reshape(Cout, K).T
    out = pallas_matmul(pm, wm, bias=bias, act_in=act_in, act_out=act_out)
    return out.reshape(N, Ho, Wo, Cout).transpose(0, 3, 1, 2)


def bilstm(x, p, k_unroll=4):
    """Bidirectional LSTM (batch_first), PyTorch semantics.  x: (B, T, In) -> (B, T, 2H).

    Both directions run in one Pallas scan (stacked on a direction axis); the input
    projection for both directions is one fused GEMM with the bias folded in."""
    B, T, In = x.shape
    H = p['w_hh_f'].shape[1]
    Hp = _round_up(H, 32)                     # 4*Hp is a multiple of 128 -> lane-dense gates

    # Input projections for both directions in one GEMM: columns = [fwd i,f,g,o | bwd i,f,g,o]
    w_cat = jnp.concatenate([p['w_ih_f'], p['w_ih_b']], axis=0).T          # (In, 8H)
    b_cat = jnp.concatenate([p['b_ih_f'] + p['b_hh_f'],
                             p['b_ih_b'] + p['b_hh_b']])                   # (8H,)
    xp = pallas_matmul(x.reshape(B * T, In), w_cat, bias=b_cat)            # (B*T, 8H) f32
    xp = xp.reshape(B, T, 2, 4, H)
    if Hp != H:
        xp = jnp.pad(xp, ((0, 0), (0, 0), (0, 0), (0, 0), (0, Hp - H)))
    xp = xp.reshape(B, T, 2, 4 * Hp).transpose(1, 2, 0, 3)                 # (T, 2, B, 4Hp)
    # time-reverse the backward direction so one forward scan handles both
    xp = jnp.concatenate([xp[:, 0:1], xp[::-1, 1:2]], axis=1)

    Bp = _round_up(B, 16)
    Tp = _round_up(T, k_unroll)
    xp = jnp.pad(xp, ((0, Tp - T), (0, 0), (0, Bp - B), (0, 0)))

    def prep_whh(w):                                                       # (4H, H)
        w4 = w.reshape(4, H, H)                                            # [gate, out, in]
        w4 = jnp.pad(w4, ((0, 0), (0, Hp - H), (0, Hp - H)))
        return w4.transpose(2, 0, 1).reshape(Hp, 4 * Hp)                   # [in, gate*out]

    whh = jnp.stack([prep_whh(p['w_hh_f']), prep_whh(p['w_hh_b'])], axis=0)

    out = pallas_lstm_scan(xp, whh, k_unroll=k_unroll)                     # (Tp, 2, Bp, Hp)
    out = out[:T, :, :B, :H]
    fwd = out[:, 0]                                                        # (T, B, H)
    bwd = out[::-1, 1]                                                     # (T, B, H)
    return jnp.concatenate([fwd, bwd], axis=-1).transpose(1, 0, 2)         # (B, T, 2H)


def rnnlayer_forward(x, p):
    bs, C, T, Fr = x.shape
    out = x.transpose(0, 3, 2, 1).reshape(bs * Fr, T, C)
    out = bilstm(out, p['sb'])                                             # (bs*F, T, 2C)
    out = out.reshape(bs, Fr, T, 2 * C).transpose(0, 2, 1, 3).reshape(bs * T, Fr, 2 * C)
    out = bilstm(out, p['fb'])                                             # (bs*T, F, 2C)
    out2 = pallas_matmul(out.reshape(bs * T * Fr, 2 * C), p['lin_w'].T, bias=p['lin_b'])
    return out2.reshape(bs, T, Fr, C).transpose(0, 3, 1, 2)


def resblock_forward(x, p):
    k = p['kernel_size']
    dil = p['dilation']
    f_ks = [3, 5, 5]
    for idx in range(3):
        c1 = p['convs1'][idx]
        c2 = p['convs2'][idx]
        d = dil[idx]
        fpad = get_padding(f_ks[idx], 1)
        # leaky_relu(x) fused as the GEMM input prologue; the post-c1 leaky_relu fused as
        # the GEMM output epilogue -> no standalone activation passes.
        xt = conv2d(x, c1['w'], c1['b'], stride=(1, 1),
                    padding=(get_padding(k, d), fpad), dilation=(d, 1),
                    act_in="lrelu", act_out="lrelu")
        xt = conv2d(xt, c2['w'], c2['b'], stride=(1, 1),
                    padding=(get_padding(k, 1), fpad), dilation=(1, 1))
        x = xt + x
    return x


def stft_pallas(audio, n_fft=640, hop=160):
    """torch.stft(center=True, reflect, hann, onesided) -> (bs, 2, n_frames, n_freqs).
    One combined [cos | -sin] DFT GEMM instead of two."""
    bs, L = audio.shape
    pad = n_fft // 2
    audio_p = jnp.pad(audio, ((0, 0), (pad, pad)), mode='reflect')
    n_frames = L // hop + 1
    idx = jnp.arange(n_frames)[:, None] * hop + jnp.arange(n_fft)[None, :]
    frames = audio_p[:, idx]                                      # (bs, n_frames, n_fft)
    window = 0.5 - 0.5 * jnp.cos(2.0 * jnp.pi * jnp.arange(n_fft) / n_fft)
    n_freqs = n_fft // 2 + 1
    nf = (jnp.arange(n_fft)[:, None] * jnp.arange(n_freqs)[None, :]) % n_fft
    ang = 2.0 * jnp.pi * nf.astype(jnp.float32) / n_fft
    cos_m = window[:, None] * jnp.cos(ang)
    sin_m = window[:, None] * (-jnp.sin(ang))
    dft = jnp.concatenate([cos_m, sin_m], axis=1).astype(jnp.float32)  # (n_fft, 2*n_freqs)
    flat = frames.reshape(bs * n_frames, n_fft).astype(jnp.float32)
    out = pallas_matmul(flat, dft)                                # (bs*n_frames, 2*n_freqs)
    out = out.reshape(bs, n_frames, 2, n_freqs).transpose(0, 2, 1, 3)
    return out                                                    # (bs, 2, T, F)


# ----------------------------------------------------------------------------
# Parameter construction (deterministic, mirrors __init__ shapes)
# ----------------------------------------------------------------------------
class ParamGen:
    def __init__(self, key):
        self.key = key

    def normal(self, shape, scale=0.02):
        self.key, sub = jax.random.split(self.key)
        return jax.random.normal(sub, shape, dtype=jnp.float32) * scale

    def zeros(self, shape):
        return jnp.zeros(shape, jnp.float32)

    def ones(self, shape):
        return jnp.ones(shape, jnp.float32)


def make_lstm_params(gen, input_size, hidden):
    p = {}
    for d in ('f', 'b'):
        p[f'w_ih_{d}'] = gen.normal((4 * hidden, input_size), 0.1)
        p[f'w_hh_{d}'] = gen.normal((4 * hidden, hidden), 0.1)
        p[f'b_ih_{d}'] = gen.normal((4 * hidden,), 0.1)
        p[f'b_hh_{d}'] = gen.normal((4 * hidden,), 0.1)
    return p


def make_rnnlayer_params(gen, channels, hidden):
    return {'sb': make_lstm_params(gen, channels, hidden),
            'fb': make_lstm_params(gen, 2 * hidden, hidden),
            'lin_w': gen.normal((channels, 2 * channels), 0.1),
            'lin_b': gen.zeros((channels,))}


def make_resblock_params(gen, channels, kernel_size, dilation):
    def conv_p(kh, kw):
        return {'w': gen.normal((channels, channels, kh, kw), 0.01),
                'b': gen.zeros((channels,))}
    ks = [(kernel_size, 3), (kernel_size, 5), (kernel_size, 5)]
    return {'convs1': [conv_p(kh, kw) for kh, kw in ks],
            'convs2': [conv_p(kh, kw) for kh, kw in ks],
            'kernel_size': kernel_size,
            'dilation': dilation}


def make_encoder_params(gen, channels, bottleneck_dim, f_kernel_size, f_stride_size,
                        resblock_kernel_sizes, resblock_dilation_sizes):
    num_layers = len(channels) - 1
    params = {'rnn': [], 'conv': [], 'norm': [], 'res': []}
    for c_idx in range(num_layers):
        params['rnn'].append(make_rnnlayer_params(gen, channels[c_idx + 1], channels[c_idx + 1]))
        params['conv'].append({
            'w': gen.normal((channels[c_idx + 1], channels[c_idx], 3, f_kernel_size[c_idx]), 0.01),
            'b': gen.zeros((channels[c_idx + 1],)),
            'stride': (1, f_stride_size[c_idx]),
            'padding': (1, 0)})
        for (k, d) in zip(list(reversed(resblock_kernel_sizes)),
                          list(reversed(resblock_dilation_sizes))):
            params['res'].append(make_resblock_params(gen, channels[c_idx + 1], k, d))
            params['norm'].append({'gamma': gen.ones((channels[c_idx + 1],)),
                                   'beta': gen.zeros((channels[c_idx + 1],))})
    # weight_norm at fresh init is an identity reparameterization -> use raw weights.
    params['conv_post'] = {'w': gen.normal((bottleneck_dim * 2, channels[-1], 1, 1), 0.01),
                           'b': gen.zeros((bottleneck_dim * 2,))}
    return params


# ----------------------------------------------------------------------------
# MixtureEncoder forward
# ----------------------------------------------------------------------------
def mixture_encoder_forward(audio, params, num_layers, num_kernels):
    # audio: (bs, 1, L)  ->  squeeze channel dim
    audio = audio[:, 0, :]
    x = stft_pallas(audio)                                    # (bs, 2, n_frames, n_freqs)
    for i in range(num_layers):
        cp = params['conv'][i]
        x = conv2d(x, cp['w'], cp['b'], stride=cp['stride'], padding=cp['padding'])
        xs = None
        for j in range(num_kernels):
            r = resblock_forward(x, params['res'][i * num_kernels + j])
            np_ = params['norm'][i * num_kernels + j]
            last = (j == num_kernels - 1)
            # GroupNorm fuses: residual accumulate (xs + r), /num_kernels scale (last) and
            # the trailing LeakyReLU (last) -- matching xs/=K ; leaky_relu(xs) in the module.
            xs = pallas_groupnorm(r, np_['gamma'], np_['beta'],
                                  residual=xs,
                                  out_scale=(1.0 / num_kernels) if last else 1.0,
                                  act_out="lrelu" if last else None)
        x = xs
        x = rnnlayer_forward(x, params['rnn'][i])
    x = conv2d(x, params['conv_post']['w'], params['conv_post']['b'])   # 1x1 -> pure GEMM
    return x


if __name__ == "__main__":
    key = jax.random.PRNGKey(0)
    k_param, k_audio = jax.random.split(key)

    # Small configuration consistent with the module structure (channels list is
    # indexed the same way; STFT params kept at the hard-coded n_fft=640 / hop=160).
    channels = [2, 8, 8]
    bottleneck_dim = 4
    f_kernel_size = [5, 3, 3, 3, 3, 4]
    f_stride_size = [2, 2, 2, 1, 1, 1]
    resblock_kernel_sizes = [3, 7]
    resblock_dilation_sizes = [[1, 3, 5], [1, 3, 5]]
    num_layers = len(channels) - 1
    num_kernels = len(resblock_kernel_sizes)

    gen = ParamGen(k_param)
    params = make_encoder_params(gen, channels, bottleneck_dim, f_kernel_size,
                                 f_stride_size, resblock_kernel_sizes,
                                 resblock_dilation_sizes)

    bs, L = 2, 1600                      # -> n_frames = 11, n_freqs = 321
    audio = jax.random.normal(k_audio, (bs, 1, L), dtype=jnp.float32)

    out = mixture_encoder_forward(audio, params, num_layers, num_kernels)
    out = jax.block_until_ready(out)
    assert out.ndim == 4 and out.shape[0] == bs and out.shape[1] == bottleneck_dim * 2, out.shape
    assert bool(jnp.all(jnp.isfinite(out)))
    print("KERNEL_OK")
</pallas_src>

<mosaic_0001>
module attributes {stable_mosaic.version = 11 : i64} {
  func.func @_matmul_kernel(%arg0: i32, %arg1: i32, %arg2: memref<32x640xf32, #tpu.memory_space<vmem>>, %arg3: memref<640x768xbf16, #tpu.memory_space<vmem>>, %arg4: memref<1x768xf32, #tpu.memory_space<vmem>>, %arg5: memref<32x768xf32, #tpu.memory_space<vmem>>, %arg6: memref<32x768xf32, #tpu.memory_space<vmem>>) attributes {dimension_semantics = [#tpu.dimension_semantics<parallel>, #tpu.dimension_semantics<arbitrary>], iteration_bounds = array<i64: 1, 1>, scalar_prefetch = 0 : i64, scratch_operands = 1 : i64, tpu.core_type = #tpu.core_type<tc>, window_params = [{transform_indices = @transform_0, window_bounds = array<i64: 32, 640>}, {transform_indices = @transform_1, window_bounds = array<i64: 640, 768>}, {pipeline_mode = #tpu.pipeline_mode<synchronous>, transform_indices = @transform_2, window_bounds = array<i64: 1, 768>}, {transform_indices = @transform_3, window_bounds = array<i64: 32, 768>}]} {
    %c0_i32 = arith.constant 0 : i32
    %0 = arith.cmpi eq, %arg1, %c0_i32 : i32
    %1 = arith.extui %0 : i1 to i32
    %c0_i32_0 = arith.constant 0 : i32
    %2 = arith.cmpi ne, %1, %c0_i32_0 : i32
    scf.if %2 {
      %cst_10 = arith.constant 0.000000e+00 : f32
      %13 = vector.broadcast %cst_10 : f32 to vector<32x768xf32>
      %c0_11 = arith.constant 0 : index
      %c0_12 = arith.constant 0 : index
      %14 = vector.load %arg6[%c0_11, %c0_12] : memref<32x768xf32, #tpu.memory_space<vmem>>, vector<32x768xf32>
      tpu.vector_store %arg6[%c0_11, %c0_12], %13 {strides = array<i32>} : memref<32x768xf32, #tpu.memory_space<vmem>>, vector<32x768xf32>,
    } else {
    }
    %c0 = arith.constant 0 : index
    %c0_1 = arith.constant 0 : index
    %3 = vector.load %arg2[%c0, %c0_1] : memref<32x640xf32, #tpu.memory_space<vmem>>, vector<32x640xf32>
    %c0_2 = arith.constant 0 : index
    %c0_3 = arith.constant 0 : index
    %4 = vector.load %arg6[%c0_2, %c0_3] : memref<32x768xf32, #tpu.memory_space<vmem>>, vector<32x768xf32>
    %5 = arith.truncf %3 : vector<32x640xf32> to vector<32x640xbf16>
    %c0_4 = arith.constant 0 : index
    %c0_5 = arith.constant 0 : index
    %6 = vector.load %arg3[%c0_4, %c0_5] : memref<640x768xbf16, #tpu.memory_space<vmem>>, vector<640x768xbf16>
    %cst = arith.constant dense<0.000000e+00> : vector<32x768xf32>
    %7 = tpu.matmul %5, %6, %cst {dimension_numbers = #tpu.dot_dimension_numbers<[1], [0], [0], [1], [0, 0, 1, 1], [], []>} : vector<32x640xbf16>, vector<640x768xbf16>, vector<32x768xf32> -> vector<32x768xf32>
    %8 = arith.addf %4, %7 : vector<32x768xf32>
    %c0_6 = arith.constant 0 : index
    %c0_7 = arith.constant 0 : index
    %9 = vector.load %arg6[%c0_6, %c0_7] : memref<32x768xf32, #tpu.memory_space<vmem>>, vector<32x768xf32>
    tpu.vector_store %arg6[%c0_6, %c0_7], %8 {strides = array<i32>} : memref<32x768xf32, #tpu.memory_space<vmem>>, vector<32x768xf32>,
    %c0_i32_8 = arith.constant 0 : i32
    %10 = arith.cmpi eq, %arg1, %c0_i32_8 : i32
    %11 = arith.extui %10 : i1 to i32
    %c0_i32_9 = arith.constant 0 : i32
    %12 = arith.cmpi ne, %11, %c0_i32_9 : i32
    scf.if %12 {
      %c0_10 = arith.constant 0 : index
      %c0_11 = arith.constant 0 : index
      %13 = vector.load %arg6[%c0_10, %c0_11] : memref<32x768xf32, #tpu.memory_space<vmem>>, vector<32x768xf32>
      %c0_12 = arith.constant 0 : index
      %c0_13 = arith.constant 0 : index
      %14 = vector.load %arg4[%c0_12, %c0_13] : memref<1x768xf32, #tpu.memory_space<vmem>>, vector<1x768xf32>
      %15 = vector.broadcast %14 : vector<1x768xf32> to vector<32x768xf32>
      %16 = arith.addf %13, %15 : vector<32x768xf32>
      %c0_14 = arith.constant 0 : index
      %c0_15 = arith.constant 0 : index
      %17 = vector.load %arg5[%c0_14, %c0_15] : memref<32x768xf32, #tpu.memory_space<vmem>>, vector<32x768xf32>
      tpu.vector_store %arg5[%c0_14, %c0_15], %16 {strides = array<i32>} : memref<32x768xf32, #tpu.memory_space<vmem>>, vector<32x768xf32>,
    } else {
    }
    return
  }
  func.func @transform_0(%arg0: i32, %arg1: i32) -> (i32, i32) {
    %c0_i32 = arith.constant 0 : i32
    return %arg0, %arg1 : i32, i32
  }
  func.func @transform_1(%arg0: i32, %arg1: i32) -> (i32, i32) {
    %c0_i32 = arith.constant 0 : i32
    %c0_i32_0 = arith.constant 0 : i32
    return %arg1, %c0_i32 : i32, i32
  }
  func.func @transform_2(%arg0: i32, %arg1: i32) -> (i32, i32) {
    %c0_i32 = arith.constant 0 : i32
    %c0_i32_0 = arith.constant 0 : i32
    %c0_i32_1 = arith.constant 0 : i32
    return %c0_i32, %c0_i32_0 : i32, i32
  }
  func.func @transform_3(%arg0: i32, %arg1: i32) -> (i32, i32) {
    %c0_i32 = arith.constant 0 : i32
    %c0_i32_0 = arith.constant 0 : i32
    return %arg0, %c0_i32 : i32, i32
  }
}

</mosaic_0001>

<bundles_post_ra>
// kernel: pallas_matmul.1
= control target key start
LH: loop header
LB: loop body
LE: loop exit
PB: predicated region body
PF: predicated region fallthrough
CT: control target
= control target key end

     0   :  { %s5248_s1 = inlined_call_operand.vmem [shape: bf16[640,768], index: 1, kind: input, shape index: {}]   ;;  %s5249_s0 = inlined_call_operand.vmem [shape: f32[32,640], index: 0, kind: input, shape index: {}]   ;;  %s5250_s2 = inlined_call_operand.vmem [shape: f32[1,768], index: 2, kind: input, shape index: {}]   ;;  %s5251_s3 = inlined_call_operand.vmem [shape: f32[32,768], index: 3, kind: output, shape index: {}]  }
   0x1   :  { %v2417_v0 = vld [vmem:[%s5248_s1 + $0x150] sm:$0xf]  ;;  %v3252_v1 = vld [vmem:[%s5248_s1 + $0x164] sm:$0xf0]  ;;  %v2393_v11 = vld [vmem:[%s5248_s1 + $0x120] sm:$0xf] }
   0x2   :  { %v2609_v2 = vld [vmem:[%s5248_s1 + $0x2d0] sm:$0xf]  ;;  %v2418_v3 = vor.u32 %v3252_v1, %v2417_v0  ;;  %v3300_v4 = vld [vmem:[%s5248_s1 + $0x2e4] sm:$0xf0]  ;;  %v3246_v13 = vld [vmem:[%s5248_s1 + $0x134] sm:$0xf0] }
   0x3   :  { %v2801_v5 = vld [vmem:[%s5248_s1 + $0x450] sm:$0xf]  ;;  %v3348_v6 = vld [vmem:[%s5248_s1 + $0x464] sm:$0xf0]  ;;  %v2610_v7 = vor.u32 %v3300_v4, %v2609_v2  ;;  %v2585_v14 = vld [vmem:[%s5248_s1 + $0x2a0] sm:$0xf]  ;;  %v2394_v16 = vor.u32 %v3246_v13, %v2393_v11 }
   0x4   :  { %v2802_v8 = vor.u32 %v3348_v6, %v2801_v5  ;;  %v2993_v9 = vld [vmem:[%s5248_s1 + $0x5d0] sm:$0xf]  ;;  %v3396_v10 = vld [vmem:[%s5248_s1 + $0x5e4] sm:$0xf0]  ;;  %1536 = vmatpush.bf16.msra.mxu0 %v2418_v3  ;;  %v3294_v15 = vld [vmem:[%s5248_s1 + $0x2b4] sm:$0xf0] }
   0x5   :  { %v2994_v12 = vor.u32 %v3396_v10, %v2993_v9  ;;  %1555 = vmatpush.bf16.msra.mxu1 %v2610_v7  ;;  %v2586_v17 = vor.u32 %v3294_v15, %v2585_v14  ;;  %v2777_v18 = vld [vmem:[%s5248_s1 + $0x420] sm:$0xf]  ;;  %v3342_v19 = vld [vmem:[%s5248_s1 + $0x434] sm:$0xf0]  ;;  %v2369_v23 = vld [vmem:[%s5248_s1 + $0xf0] sm:$0xf] }
   0x6   :  { %1574 = vmatpush.bf16.msra.mxu2 %v2802_v8  ;;  %v2969_v20 = vld [vmem:[%s5248_s1 + $0x5a0] sm:$0xf]  ;;  %v2778_v21 = vor.u32 %v3342_v19, %v2777_v18  ;;  %v3390_v22 = vld [vmem:[%s5248_s1 + $0x5b4] sm:$0xf0]  ;;  %v3240_v24 = vld [vmem:[%s5248_s1 + $0x104] sm:$0xf0] }
   0x7   :  { %1593 = vmatpush.bf16.msra.mxu3 %v2994_v12  ;;  %v2970_v25 = vor.u32 %v3390_v22, %v2969_v20  ;;  %v2561_v26 = vld [vmem:[%s5248_s1 + $0x270] sm:$0xf]  ;;  %v3288_v27 = vld [vmem:[%s5248_s1 + $0x284] sm:$0xf0]  ;;  %v2370_v29 = vor.u32 %v3240_v24, %v2369_v23  ;;  %v2345_v35 = vld [vmem:[%s5248_s1 + $0xc0] sm:$0xf] }
   0x8   :  { %v2753_v28 = vld [vmem:[%s5248_s1 + $0x3f0] sm:$0xf]  ;;  %1537 = vmatpush.bf16.msra.mxu0 %v2394_v16  ;;  %v3336_v30 = vld [vmem:[%s5248_s1 + $0x404] sm:$0xf0]  ;;  %v2562_v33 = vor.u32 %v3288_v27, %v2561_v26  ;;  %v3234_v36 = vld [vmem:[%s5248_s1 + $0xd4] sm:$0xf0] }
   0x9   :  { %v2945_v31 = vld [vmem:[%s5248_s1 + $0x570] sm:$0xf]  ;;  %v3384_v32 = vld [vmem:[%s5248_s1 + $0x584] sm:$0xf0]  ;;  %1556 = vmatpush.bf16.msra.mxu1 %v2586_v17  ;;  %v2754_v34 = vor.u32 %v3336_v30, %v2753_v28  ;;  %v2537_v37 = vld [vmem:[%s5248_s1 + $0x240] sm:$0xf]  ;;  %v2346_v44 = vor.u32 %v3234_v36, %v2345_v35 }
   0xa   :  { %1575 = vmatpush.bf16.msra.mxu2 %v2778_v21  ;;  %v2946_v38 = vor.u32 %v3384_v32, %v2945_v31  ;;  %v3282_v39 = vld [vmem:[%s5248_s1 + $0x254] sm:$0xf0]  ;;  %v2729_v40 = vld [vmem:[%s5248_s1 + $0x3c0] sm:$0xf]  ;;  %v2321_v47 = vld [vmem:[%s5248_s1 + $0x90] sm:$0xf] }
   0xb   :  { %1594 = vmatpush.bf16.msra.mxu3 %v2970_v25  ;;  %v3330_v41 = vld [vmem:[%s5248_s1 + $0x3d4] sm:$0xf0]  ;;  %v2921_v42 = vld [vmem:[%s5248_s1 + $0x540] sm:$0xf]  ;;  %v2538_v45 = vor.u32 %v3282_v39, %v2537_v37  ;;  %v3228_v48 = vld [vmem:[%s5248_s1 + $0xa4] sm:$0xf0] }
   0xc   :  { %v3378_v43 = vld [vmem:[%s5248_s1 + $0x554] sm:$0xf0]  ;;  %1538 = vmatpush.bf16.msra.mxu0 %v2370_v29  ;;  %v2730_v46 = vor.u32 %v3330_v41, %v2729_v40  ;;  %v2513_v49 = vld [vmem:[%s5248_s1 + $0x210] sm:$0xf]  ;;  %v3276_v51 = vld [vmem:[%s5248_s1 + $0x224] sm:$0xf0]  ;;  %v2322_v56 = vor.u32 %v3228_v48, %v2321_v47 }
   0xd   :  { %1557 = vmatpush.bf16.msra.mxu1 %v2562_v33  ;;  %v2922_v50 = vor.u32 %v3378_v43, %v2921_v42  ;;  %v2705_v52 = vld [vmem:[%s5248_s1 + $0x390] sm:$0xf]  ;;  %v3324_v53 = vld [vmem:[%s5248_s1 + $0x3a4] sm:$0xf0]  ;;  %v2514_v57 = vor.u32 %v3276_v51, %v2513_v49  ;;  %v2297_v59 = vld [vmem:[%s5248_s1 + $0x60] sm:$0xf] }
   0xe   :  { %1576 = vmatpush.bf16.msra.mxu2 %v2754_v34  ;;  %v2897_v54 = vld [vmem:[%s5248_s1 + $0x510] sm:$0xf]  ;;  %v3372_v55 = vld [vmem:[%s5248_s1 + $0x524] sm:$0xf0]  ;;  %v2706_v58 = vor.u32 %v3324_v53, %v2705_v52  ;;  %v3222_v60 = vld [vmem:[%s5248_s1 + $0x74] sm:$0xf0] }
   0xf   :  { %1595 = vmatpush.bf16.msra.mxu3 %v2946_v38  ;;  %v2489_v61 = vld [vmem:[%s5248_s1 + $0x1e0] sm:$0xf]  ;;  %v2898_v62 = vor.u32 %v3372_v55, %v2897_v54  ;;  %v3270_v63 = vld [vmem:[%s5248_s1 + $0x1f4] sm:$0xf0]  ;;  %v2298_v4 = vor.u32 %v3222_v60, %v2297_v59  ;;  %v2273_v7 = vld [vmem:[%s5248_s1 + $0x30] sm:$0xf] }
  0x10   :  { %1539 = vmatpush.bf16.msra.mxu0 %v2346_v44  ;;  %v2681_v0 = vld [vmem:[%s5248_s1 + $0x360] sm:$0xf]  ;;  %v3318_v1 = vld [vmem:[%s5248_s1 + $0x374] sm:$0xf0]  ;;  %v2490_v5 = vor.u32 %v3270_v63, %v2489_v61  ;;  %v3216_v8 = vld [vmem:[%s5248_s1 + $0x44] sm:$0xf0] }
  0x11   :  { %1558 = vmatpush.bf16.msra.mxu1 %v2538_v45  ;;  %v2873_v2 = vld [vmem:[%s5248_s1 + $0x4e0] sm:$0xf]  ;;  %v3366_v3 = vld [vmem:[%s5248_s1 + $0x4f4] sm:$0xf0]  ;;  %v2682_v6 = vor.u32 %v3318_v1, %v2681_v0  ;;  %v2465_v9 = vld [vmem:[%s5248_s1 + $0x1b0] sm:$0xf]  ;;  %v2274_v17 = vor.u32 %v3216_v8, %v2273_v7 }
  0x12   :  { %1577 = vmatpush.bf16.msra.mxu2 %v2730_v46  ;;  %v2874_v10 = vor.u32 %v3366_v3, %v2873_v2  ;;  %v3264_v11 = vld [vmem:[%s5248_s1 + $0x1c4] sm:$0xf0]  ;;  %v2657_v12 = vld [vmem:[%s5248_s1 + $0x330] sm:$0xf]  ;;  %v2249_v16 = vld [vmem:[%s5248_s1] sm:$0xf] }
  0x13   :  { %1596 = vmatpush.bf16.msra.mxu3 %v2922_v50  ;;  %v3312_v13 = vld [vmem:[%s5248_s1 + $0x344] sm:$0xf0]  ;;  %v2849_v14 = vld [vmem:[%s5248_s1 + $0x4b0] sm:$0xf]  ;;  %v3210_v18 = vld [vmem:[%s5248_s1 + $0x14] sm:$0xf0]  ;;  %v2466_v21 = vor.u32 %v3264_v11, %v2465_v9 }
  0x14   :  { %1540 = vmatpush.bf16.msra.mxu0 %v2322_v56  ;;  %v3360_v15 = vld [vmem:[%s5248_s1 + $0x4c4] sm:$0xf0]  ;;  %v2441_v19 = vld [vmem:[%s5248_s1 + $0x180] sm:$0xf]  ;;  %v3258_v20 = vld [vmem:[%s5248_s1 + $0x194] sm:$0xf0]  ;;  %v2658_v22 = vor.u32 %v3312_v13, %v2657_v12  ;;  %v2250_v34 = vor.u32 %v3210_v18, %v2249_v16 }
  0x15   :  { %1559 = vmatpush.bf16.msra.mxu1 %v2514_v57  ;;  %v2633_v23 = vld [vmem:[%s5248_s1 + $0x300] sm:$0xf]  ;;  %v3306_v24 = vld [vmem:[%s5248_s1 + $0x314] sm:$0xf0]  ;;  %v2850_v26 = vor.u32 %v3360_v15, %v2849_v14  ;;  %v47_v29 = vld [vmem:[%s5249_s0 + $0x28] sm:$0xff]  ;;  %v2442_v38 = vor.u32 %v3258_v20, %v2441_v19 }
  0x16   :  { %1578 = vmatpush.bf16.msra.mxu2 %v2706_v58  ;;  %v2825_v25 = vld [vmem:[%s5248_s1 + $0x480] sm:$0xf]  ;;  %v3354_v27 = vld [vmem:[%s5248_s1 + $0x494] sm:$0xf0]  ;;  %v43_v30 = vld [vmem:[%s5249_s0 + $0x8] sm:$0xff]  ;;  %v2634_v39 = vor.u32 %v3306_v24, %v2633_v23 }
  0x17   :  { %1597 = vmatpush.bf16.msra.mxu3 %v2898_v62  ;;  %v42_v28 = vld [vmem:[%s5249_s0] sm:$0xff]  ;;  %v48_v31 = vld [vmem:[%s5249_s0 + $0x30] sm:$0xff]  ;;  %v2611_v33 = vld [vmem:[%s5248_s1 + $0x2e8] sm:$0xf0]  ;;  %v2826_v43 = vor.u32 %v3354_v27, %v2825_v25 }
  0x18   :  { %1541 = vmatpush.bf16.msra.mxu0 %v2298_v4  ;;  %v3297_v32 = vld [vmem:[%s5248_s1 + $0x2d4] sm:$0xf]  ;;  %v2419_v37 = vld [vmem:[%s5248_s1 + $0x168] sm:$0xf0]  ;;  %v49_v40 = vld [vmem:[%s5249_s0 + $0x38] sm:$0xff]  ;;  %v3720_v48 = vpack.c.bf16 %v47_v29, %v42_v28  ;;  %v3731_v53 = vpack.c.bf16 %v48_v31, %v43_v30 }
  0x19   :  { %1560 = vmatpush.bf16.msra.mxu1 %v2490_v5  ;;  %v44_v35 = vld [vmem:[%s5249_s0 + $0x10] sm:$0xff]  ;;  %v45_v41 = vld [vmem:[%s5249_s0 + $0x18] sm:$0xff]  ;;  %v50_v42 = vld [vmem:[%s5249_s0 + $0x40] sm:$0xff]  ;;  %v2614_v44 = vor.u32 %v3297_v32, %v2611_v33 }
  0x1a   :  { %1579 = vmatpush.bf16.msra.mxu2 %v2682_v6  ;;  %v3249_v36 = vld [vmem:[%s5248_s1 + $0x154] sm:$0xf]  ;;  %v3185_v45 = vld [vmem:[%s5248_s1 + $0x750] sm:$0xf]  ;;  %v3444_v46 = vld [vmem:[%s5248_s1 + $0x764] sm:$0xf0]  ;;  %v3733_v54 = vpack.c.bf16 %v49_v40, %v44_v35  ;;  %v3741_v57 = vpack.c.bf16 %v50_v42, %v45_v41 }
  0x1b   :  { %1598 = vmatpush.bf16.msra.mxu3 %v2874_v10  ;;  %v3345_v47 = vld [vmem:[%s5248_s1 + $0x454] sm:$0xf]  ;;  %v2422_v49 = vor.u32 %v3249_v36, %v2419_v37  ;;  %v2803_v50 = vld [vmem:[%s5248_s1 + $0x468] sm:$0xf0]  ;;  %v3291_v51 = vld [vmem:[%s5248_s1 + $0x2a4] sm:$0xf]  ;;  %v3186_v58 = vor.u32 %v3444_v46, %v3185_v45 }
  0x1c   :  { %1542 = vmatpush.bf16.msra.mxu0 %v2274_v17  ;;  %v2587_v52 = vld [vmem:[%s5248_s1 + $0x2b8] sm:$0xf0]  ;;  %v3243_v55 = vld [vmem:[%s5248_s1 + $0x124] sm:$0xf]  ;;  %v2806_v59 = vor.u32 %v3345_v47, %v2803_v50  ;;  %v3161_v61 = vld [vmem:[%s5248_s1 + $0x720] sm:$0xf] }
  0x1d   :  { %1561 = vmatpush.bf16.msra.mxu1 %v2466_v21  ;;  %v2395_v56 = vld [vmem:[%s5248_s1 + $0x138] sm:$0xf0]  ;;  %v2590_v60 = vor.u32 %v3291_v51, %v2587_v52  ;;  %v3438_v62 = vld [vmem:[%s5248_s1 + $0x734] sm:$0xf0]  ;;  %v3339_v63 = vld [vmem:[%s5248_s1 + $0x424] sm:$0xf] }
  0x1e   :  { %1580 = vmatpush.bf16.msra.mxu2 %v2658_v22  ;;  %v2398_v0 = vor.u32 %v3243_v55, %v2395_v56  ;;  %v2779_v1 = vld [vmem:[%s5248_s1 + $0x438] sm:$0xf0]  ;;  %v3285_v2 = vld [vmem:[%s5248_s1 + $0x274] sm:$0xf]  ;;  %v2563_v3 = vld [vmem:[%s5248_s1 + $0x288] sm:$0xf0]  ;;  %v3162_v6 = vor.u32 %v3438_v62, %v3161_v61 }
  0x1f   :  { %1599 = vmatpush.bf16.msra.mxu3 %v2850_v26  ;;  %v3237_v4 = vld [vmem:[%s5248_s1 + $0xf4] sm:$0xf]  ;;  %v2371_v5 = vld [vmem:[%s5248_s1 + $0x108] sm:$0xf0]  ;;  %v2782_v7 = vor.u32 %v3339_v63, %v2779_v1  ;;  %v2566_v8 = vor.u32 %v3285_v2, %v2563_v3  ;;  %v3137_v9 = vld [vmem:[%s5248_s1 + $0x6f0] sm:$0xf] }
  0x20   :  { %1543 = vmatpush.bf16.msra.mxu0 %v2250_v34  ;;  %v3432_v10 = vld [vmem:[%s5248_s1 + $0x704] sm:$0xf0]  ;;  %v3333_v11 = vld [vmem:[%s5248_s1 + $0x3f4] sm:$0xf]  ;;  %v2374_v12 = vor.u32 %v3237_v4, %v2371_v5  ;;  %v2755_v13 = vld [vmem:[%s5248_s1 + $0x408] sm:$0xf0] }
  0x21   :  { %1562 = vmatpush.bf16.msra.mxu1 %v2442_v38  ;;  %v3279_v14 = vld [vmem:[%s5248_s1 + $0x244] sm:$0xf]  ;;  %v2539_v15 = vld [vmem:[%s5248_s1 + $0x258] sm:$0xf0]  ;;  %v3138_v18 = vor.u32 %v3432_v10, %v3137_v9  ;;  %v3113_v19 = vld [vmem:[%s5248_s1 + $0x6c0] sm:$0xf]  ;;  %v2758_v22 = vor.u32 %v3333_v11, %v2755_v13 }
  0x22   :  { %1581 = vmatpush.bf16.msra.mxu2 %v2634_v39  ;;  %v3231_v16 = vld [vmem:[%s5248_s1 + $0xc4] sm:$0xf]  ;;  %v2347_v17 = vld [vmem:[%s5248_s1 + $0xd8] sm:$0xf0]  ;;  %v3426_v20 = vld [vmem:[%s5248_s1 + $0x6d4] sm:$0xf0]  ;;  %v2542_v23 = vor.u32 %v3279_v14, %v2539_v15 }
  0x23   :  { %1600 = vmatpush.bf16.msra.mxu3 %v2826_v43  ;;  %1544 = vmatmul.bf16.vlgmr.msra.gmra.mxu0 %v3720_v48  ;;  %v3327_v21 = vld [vmem:[%s5248_s1 + $0x3c4] sm:$0xf]  ;;  %v2731_v24 = vld [vmem:[%s5248_s1 + $0x3d8] sm:$0xf0]  ;;  %v52_v25 = vld [vmem:[%s5249_s0 + $0x50] sm:$0xff]  ;;  %v2350_v27 = vor.u32 %v3231_v16, %v2347_v17  ;;  %v3114_v35 = vor.u32 %v3426_v20, %v3113_v19 }
  0x24   :  { %1563 = vmatmul.bf16.vlgmr.msra.gmra.mxu1 %v3731_v53  ;;  %1612 = vmatpush.bf16.msrb.mxu0 %v3186_v58  ;;  %v57_v26 = vld [vmem:[%s5249_s0 + $0x78] sm:$0xff]  ;;  %v58_v29 = vld [vmem:[%s5249_s0 + $0x80] sm:$0xff]  ;;  %v3273_v30 = vld [vmem:[%s5248_s1 + $0x214] sm:$0xf]  ;;  %v2734_v39 = vor.u32 %v3327_v21, %v2731_v24 }
  0x25   :  { %1631 = vmatpush.bf16.msrb.mxu1 %v2422_v49  ;;  %1582 = vmatmul.bf16.vlgmr.msra.gmra.mxu2 %v3733_v54  ;;  %v53_v28 = vld [vmem:[%s5249_s0 + $0x58] sm:$0xff]  ;;  %v2515_v31 = vld [vmem:[%s5248_s1 + $0x228] sm:$0xf0]  ;;  %v54_v32 = vld [vmem:[%s5249_s0 + $0x60] sm:$0xff] }
  0x26   :  { %1650 = vmatpush.bf16.msrb.mxu2 %v2614_v44  ;;  %1601 = vmatmul.bf16.vlgmr.msra.gmra.mxu3 %v3741_v57  ;;  %v3225_v33 = vld [vmem:[%s5248_s1 + $0x94] sm:$0xf]  ;;  %v2323_v34 = vld [vmem:[%s5248_s1 + $0xa8] sm:$0xf0]  ;;  %v2518_v40 = vor.u32 %v3273_v30, %v2515_v31  ;;  %v3089_v41 = vld [vmem:[%s5248_s1 + $0x690] sm:$0xf]  ;;  %v3852_v44 = vpack.c.bf16 %v57_v26, %v52_v25  ;;  %v3863_v50 = vpack.c.bf16 %v58_v29, %v53_v28 }
  0x27   :  { %1669 = vmatpush.bf16.msrb.mxu3 %v2806_v59  ;;  %v59_v36 = vld [vmem:[%s5249_s0 + $0x88] sm:$0xff]  ;;  %v60_v38 = vld [vmem:[%s5249_s0 + $0x90] sm:$0xff]  ;;  %v2326_v45 = vor.u32 %v3225_v33, %v2323_v34  ;;  %v3267_v47 = vld [vmem:[%s5248_s1 + $0x1e4] sm:$0xf] }
  0x28   :  { %1613 = vmatpush.bf16.msrb.mxu0 %v3162_v6  ;;  %v55_v37 = vld [vmem:[%s5249_s0 + $0x68] sm:$0xff]  ;;  %v3321_v43 = vld [vmem:[%s5248_s1 + $0x394] sm:$0xf]  ;;  %v2491_v49 = vld [vmem:[%s5248_s1 + $0x1f8] sm:$0xf0]  ;;  %v3865_v51 = vpack.c.bf16 %v59_v36, %v54_v32 }
  0x29   :  { %1632 = vmatpush.bf16.msrb.mxu1 %v2398_v0  ;;  %v3420_v42 = vld [vmem:[%s5248_s1 + $0x6a4] sm:$0xf0]  ;;  %v2707_v46 = vld [vmem:[%s5248_s1 + $0x3a8] sm:$0xf0]  ;;  %v3219_v52 = vld [vmem:[%s5248_s1 + $0x64] sm:$0xf]  ;;  %v3873_v56 = vpack.c.bf16 %v60_v38, %v55_v37 }
  0x2a   :  { %1651 = vmatpush.bf16.msrb.mxu2 %v2590_v60  ;;  %v2299_v55 = vld [vmem:[%s5248_s1 + $0x78] sm:$0xf0]  ;;  %v3090_v58 = vor.u32 %v3420_v42, %v3089_v41  ;;  %v2710_v59 = vor.u32 %v3321_v43, %v2707_v46  ;;  %v2494_v60 = vor.u32 %v3267_v47, %v2491_v49  ;;  %v3065_v61 = vld [vmem:[%s5248_s1 + $0x660] sm:$0xf]  ;;  %v3414_v62 = vld [vmem:[%s5248_s1 + $0x674] sm:$0xf0] }
  0x2b   :  { %1670 = vmatpush.bf16.msrb.mxu3 %v2782_v7  ;;  %v3315_v63 = vld [vmem:[%s5248_s1 + $0x364] sm:$0xf]  ;;  %v2302_v0 = vor.u32 %v3219_v52, %v2299_v55  ;;  %v2683_v1 = vld [vmem:[%s5248_s1 + $0x378] sm:$0xf0]  ;;  %v3261_v2 = vld [vmem:[%s5248_s1 + $0x1b4] sm:$0xf]  ;;  %v3066_v6 = vor.u32 %v3414_v62, %v3065_v61 }
  0x2c   :  { %1614 = vmatpush.bf16.msrb.mxu0 %v3138_v18  ;;  %v2467_v3 = vld [vmem:[%s5248_s1 + $0x1c8] sm:$0xf0]  ;;  %v3213_v4 = vld [vmem:[%s5248_s1 + $0x34] sm:$0xf]  ;;  %v3041_v7 = vld [vmem:[%s5248_s1 + $0x630] sm:$0xf] }
  0x2d   :  { %1633 = vmatpush.bf16.msrb.mxu1 %v2374_v12  ;;  %v2275_v5 = vld [vmem:[%s5248_s1 + $0x48] sm:$0xf0]  ;;  %v2470_v9 = vor.u32 %v3261_v2, %v2467_v3  ;;  %v3408_v10 = vld [vmem:[%s5248_s1 + $0x644] sm:$0xf0]  ;;  %v3309_v11 = vld [vmem:[%s5248_s1 + $0x334] sm:$0xf] }
  0x2e   :  { %1652 = vmatpush.bf16.msrb.mxu2 %v2566_v8  ;;  %v2686_v8 = vor.u32 %v3315_v63, %v2683_v1  ;;  %v2659_v12 = vld [vmem:[%s5248_s1 + $0x348] sm:$0xf0]  ;;  %v2278_v13 = vor.u32 %v3213_v4, %v2275_v5  ;;  %v3255_v14 = vld [vmem:[%s5248_s1 + $0x184] sm:$0xf]  ;;  %v2443_v15 = vld [vmem:[%s5248_s1 + $0x198] sm:$0xf0]  ;;  %v3042_v20 = vor.u32 %v3408_v10, %v3041_v7 }
  0x2f   :  { %1671 = vmatpush.bf16.msrb.mxu3 %v2758_v22  ;;  %v3207_v16 = vld [vmem:[%s5248_s1 + $0x4] sm:$0xf]  ;;  %v2251_v17 = vld [vmem:[%s5248_s1 + $0x18] sm:$0xf0]  ;;  %v2425_v18 = vld [vmem:[%s5248_s1 + $0x158] sm:$0xf]  ;;  %v2662_v24 = vor.u32 %v3309_v11, %v2659_v12  ;;  %v2446_v25 = vor.u32 %v3255_v14, %v2443_v15 }
  0x30   :  { %1615 = vmatpush.bf16.msrb.mxu0 %v3114_v35  ;;  %v3253_v19 = vld [vmem:[%s5248_s1 + $0x16c] sm:$0xf0]  ;;  %v3017_v21 = vld [vmem:[%s5248_s1 + $0x600] sm:$0xf]  ;;  %v3441_v22 = vld [vmem:[%s5248_s1 + $0x754] sm:$0xf]  ;;  %v2254_v29 = vor.u32 %v3207_v16, %v2251_v17 }
  0x31   :  { %1634 = vmatpush.bf16.msrb.mxu1 %v2350_v27  ;;  %v3402_v26 = vld [vmem:[%s5248_s1 + $0x614] sm:$0xf0]  ;;  %v3303_v27 = vld [vmem:[%s5248_s1 + $0x304] sm:$0xf]  ;;  %v2635_v28 = vld [vmem:[%s5248_s1 + $0x318] sm:$0xf0]  ;;  %v2426_v30 = vor.u32 %v3253_v19, %v2425_v18 }
  0x32   :  { %1653 = vmatpush.bf16.msrb.mxu2 %v2542_v23  ;;  %v3187_v23 = vld [vmem:[%s5248_s1 + $0x768] sm:$0xf0]  ;;  %v3393_v31 = vld [vmem:[%s5248_s1 + $0x5d4] sm:$0xf]  ;;  %v2617_v33 = vld [vmem:[%s5248_s1 + $0x2d8] sm:$0xf]  ;;  %v3018_v38 = vor.u32 %v3402_v26, %v3017_v21  ;;  %v2638_v41 = vor.u32 %v3303_v27, %v2635_v28 }
  0x33   :  { %1672 = vmatpush.bf16.msrb.mxu3 %v2734_v39  ;;  %1549 = vmatmul.bf16.gmra.mxu0 %v3852_v44  ;;  %v2995_v32 = vld [vmem:[%s5248_s1 + $0x5e8] sm:$0xf0]  ;;  %v3190_v34 = vor.u32 %v3441_v22, %v3187_v23  ;;  %v3301_v35 = vld [vmem:[%s5248_s1 + $0x2ec] sm:$0xf0]  ;;  %v2401_v36 = vld [vmem:[%s5248_s1 + $0x128] sm:$0xf] }
  0x34   :  { %1568 = vmatmul.bf16.gmra.mxu1 %v3863_v50  ;;  %1616 = vmatpush.bf16.msrb.mxu0 %v3090_v58  ;;  %v3247_v37 = vld [vmem:[%s5248_s1 + $0x13c] sm:$0xf0]  ;;  %v2998_v42 = vor.u32 %v3393_v31, %v2995_v32  ;;  %v3387_v43 = vld [vmem:[%s5248_s1 + $0x5a4] sm:$0xf]  ;;  %v2618_v46 = vor.u32 %v3301_v35, %v2617_v33  ;;  %v3163_v52 = vld [vmem:[%s5248_s1 + $0x738] sm:$0xf0] }
  0x35   :  { %1635 = vmatpush.bf16.msrb.mxu1 %v2326_v45  ;;  %1587 = vmatmul.bf16.gmra.mxu2 %v3865_v51  ;;  %v46_v39 = vld [vmem:[%s5249_s0 + $0x20] sm:$0xff]  ;;  %v2971_v45 = vld [vmem:[%s5248_s1 + $0x5b8] sm:$0xf0]  ;;  %v2402_v47 = vor.u32 %v3247_v37, %v2401_v36  ;;  %v2593_v55 = vld [vmem:[%s5248_s1 + $0x2a8] sm:$0xf] }
  0x36   :  { %1654 = vmatpush.bf16.msrb.mxu2 %v2518_v40  ;;  %1606 = vmatmul.bf16.gmra.mxu3 %v3873_v56  ;;  %v51_v40 = vld [vmem:[%s5249_s0 + $0x48] sm:$0xff]  ;;  %v3435_v49 = vld [vmem:[%s5248_s1 + $0x724] sm:$0xf]  ;;  %v3241_v61 = vld [vmem:[%s5248_s1 + $0x10c] sm:$0xf0]  ;;  %v2974_v62 = vor.u32 %v3387_v43, %v2971_v45 }
  0x37   :  { %1673 = vmatpush.bf16.msrb.mxu3 %v2710_v59  ;;  %v3990_v58 = vpack.c.bf16 %v51_v40, %v46_v39  ;;  %v3295_v59 = vld [vmem:[%s5248_s1 + $0x2bc] sm:$0xf0]  ;;  %v3166_v63 = vor.u32 %v3435_v49, %v3163_v52  ;;  %v2947_v1 = vld [vmem:[%s5248_s1 + $0x588] sm:$0xf0]  ;;  %v3429_v4 = vld [vmem:[%s5248_s1 + $0x6f4] sm:$0xf] }
  0x38   :  { %1617 = vmatpush.bf16.msrb.mxu0 %v3066_v6  ;;  %v2594_v2 = vor.u32 %v3295_v59, %v2593_v55  ;;  %v3139_v5 = vld [vmem:[%s5248_s1 + $0x708] sm:$0xf0]  ;;  %v2569_v6 = vld [vmem:[%s5248_s1 + $0x278] sm:$0xf]  ;;  %v3289_v7 = vld [vmem:[%s5248_s1 + $0x28c] sm:$0xf0] }
  0x39   :  { %1636 = vmatpush.bf16.msrb.mxu1 %v2302_v0  ;;  %v3381_v0 = vld [vmem:[%s5248_s1 + $0x574] sm:$0xf]  ;;  %v3142_v11 = vor.u32 %v3429_v4, %v3139_v5  ;;  %v3375_v12 = vld [vmem:[%s5248_s1 + $0x544] sm:$0xf]  ;;  %v2570_v14 = vor.u32 %v3289_v7, %v2569_v6  ;;  %v3115_v17 = vld [vmem:[%s5248_s1 + $0x6d8] sm:$0xf0] }
  0x3a   :  { %1655 = vmatpush.bf16.msrb.mxu2 %v2494_v60  ;;  %v2377_v60 = vld [vmem:[%s5248_s1 + $0xf8] sm:$0xf]  ;;  %v2950_v10 = vor.u32 %v3381_v0, %v2947_v1  ;;  %v3423_v16 = vld [vmem:[%s5248_s1 + $0x6c4] sm:$0xf]  ;;  %v2545_v18 = vld [vmem:[%s5248_s1 + $0x248] sm:$0xf] }
  0x3b   :  { %1674 = vmatpush.bf16.msrb.mxu3 %v2686_v8  ;;  %v2378_v3 = vor.u32 %v3241_v61, %v2377_v60  ;;  %v2353_v8 = vld [vmem:[%s5248_s1 + $0xc8] sm:$0xf]  ;;  %v3283_v19 = vld [vmem:[%s5248_s1 + $0x25c] sm:$0xf0]  ;;  %v3229_v21 = vld [vmem:[%s5248_s1 + $0xac] sm:$0xf0]  ;;  %v3118_v23 = vor.u32 %v3423_v16, %v3115_v17 }
  0x3c   :  { %1618 = vmatpush.bf16.msrb.mxu0 %v3042_v20  ;;  %v2329_v20 = vld [vmem:[%s5248_s1 + $0x98] sm:$0xf]  ;;  %v2546_v26 = vor.u32 %v3283_v19, %v2545_v18  ;;  %v3417_v28 = vld [vmem:[%s5248_s1 + $0x694] sm:$0xf]  ;;  %v3277_v31 = vld [vmem:[%s5248_s1 + $0x22c] sm:$0xf0] }
  0x3d   :  { %1637 = vmatpush.bf16.msrb.mxu1 %v2278_v13  ;;  %v2923_v13 = vld [vmem:[%s5248_s1 + $0x558] sm:$0xf0]  ;;  %v2330_v27 = vor.u32 %v3229_v21, %v2329_v20  ;;  %v2305_v32 = vld [vmem:[%s5248_s1 + $0x68] sm:$0xf]  ;;  %v3223_v33 = vld [vmem:[%s5248_s1 + $0x7c] sm:$0xf0] }
  0x3e   :  { %1656 = vmatpush.bf16.msrb.mxu2 %v2470_v9  ;;  %v3235_v9 = vld [vmem:[%s5248_s1 + $0xdc] sm:$0xf0]  ;;  %v2926_v22 = vor.u32 %v3375_v12, %v2923_v13  ;;  %v61_v35 = vld [vmem:[%s5249_s0 + $0x98] sm:$0xff]  ;;  %v2497_v45 = vld [vmem:[%s5248_s1 + $0x1e8] sm:$0xf] }
  0x3f   :  { %1675 = vmatpush.bf16.msrb.mxu3 %v2662_v24  ;;  %v2354_v15 = vor.u32 %v3235_v9, %v2353_v8  ;;  %v3369_v24 = vld [vmem:[%s5248_s1 + $0x514] sm:$0xf]  ;;  %v2875_v39 = vld [vmem:[%s5248_s1 + $0x4f8] sm:$0xf0]  ;;  %v2281_v49 = vld [vmem:[%s5248_s1 + $0x38] sm:$0xf] }
  0x40   :  { %1619 = vmatpush.bf16.msrb.mxu0 %v3018_v38  ;;  %v3363_v38 = vld [vmem:[%s5248_s1 + $0x4e4] sm:$0xf]  ;;  %v3067_v43 = vld [vmem:[%s5248_s1 + $0x678] sm:$0xf0]  ;;  %v3217_v52 = vld [vmem:[%s5248_s1 + $0x4c] sm:$0xf0] }
  0x41   :  { %1638 = vmatpush.bf16.msrb.mxu1 %v2254_v29  ;;  %v3091_v29 = vld [vmem:[%s5248_s1 + $0x6a8] sm:$0xf0]  ;;  %v2878_v55 = vor.u32 %v3363_v38, %v2875_v39  ;;  %v3357_v60 = vld [vmem:[%s5248_s1 + $0x4b4] sm:$0xf]  ;;  %v2257_v4 = vld [vmem:[%s5248_s1 + $0x8] sm:$0xf] }
  0x42   :  { %1657 = vmatpush.bf16.msrb.mxu2 %v2446_v25  ;;  %v2899_v25 = vld [vmem:[%s5248_s1 + $0x528] sm:$0xf0]  ;;  %v3094_v37 = vor.u32 %v3417_v28, %v3091_v29  ;;  %v3405_v0 = vld [vmem:[%s5248_s1 + $0x634] sm:$0xf]  ;;  %v3211_v5 = vld [vmem:[%s5248_s1 + $0x1c] sm:$0xf0] }
  0x43   :  { %1676 = vmatpush.bf16.msrb.mxu3 %v2638_v41  ;;  %1620 = vmatmul.bf16.vlgmr.msrb.gmra.mxu0 %v3990_v58  ;;  %v2902_v36 = vor.u32 %v3369_v24, %v2899_v25  ;;  %v2306_v41 = vor.u32 %v3223_v33, %v2305_v32  ;;  %v2851_v61 = vld [vmem:[%s5248_s1 + $0x4c8] sm:$0xf0]  ;;  %v3193_v6 = vld [vmem:[%s5248_s1 + $0x758] sm:$0xf]  ;;  %v3445_v7 = vld [vmem:[%s5248_s1 + $0x76c] sm:$0xf0] }
  0x44   :  { %1688 = vmatpush.bf16.msra.mxu0 %v2998_v42  ;;  %1639 = vmatmul.bf16.vlgmr.msrb.gmra.mxu1 %v3720_v48  ;;  %v3411_v42 = vld [vmem:[%s5248_s1 + $0x664] sm:$0xf]  ;;  %v3043_v1 = vld [vmem:[%s5248_s1 + $0x648] sm:$0xf0]  ;;  %v2854_v8 = vor.u32 %v3357_v60, %v2851_v61  ;;  %v2449_v16 = vld [vmem:[%s5248_s1 + $0x188] sm:$0xf]  ;;  %v3194_v18 = vor.u32 %v3445_v7, %v3193_v6 }
  0x45   :  { %1707 = vmatpush.bf16.msra.mxu1 %v3190_v34  ;;  %1658 = vmatmul.bf16.vlgmr.msrb.gmra.mxu2 %v3731_v53  ;;  %v56_v34 = vld [vmem:[%s5249_s0 + $0x70] sm:$0xff]  ;;  %v3070_v59 = vor.u32 %v3411_v42, %v3067_v43  ;;  %v3046_v9 = vor.u32 %v3405_v0, %v3043_v1  ;;  %v3399_v12 = vld [vmem:[%s5248_s1 + $0x604] sm:$0xf]  ;;  %v3259_v17 = vld [vmem:[%s5248_s1 + $0x19c] sm:$0xf0] }
  0x46   :  { %1726 = vmatpush.bf16.msra.mxu2 %v2426_v30  ;;  %1677 = vmatmul.bf16.vlgmr.msrb.gmra.mxu3 %v3733_v54  ;;  %v2521_v30 = vld [vmem:[%s5248_s1 + $0x218] sm:$0xf]  ;;  %v3349_v20 = vld [vmem:[%s5248_s1 + $0x46c] sm:$0xf0]  ;;  %v2427_v24 = vld [vmem:[%s5248_s1 + $0x170] sm:$0xf0]  ;;  %v2450_v29 = vor.u32 %v3259_v17, %v2449_v16 }
  0x47   :  { %1745 = vmatpush.bf16.msra.mxu3 %v2618_v46  ;;  %v2522_v40 = vor.u32 %v3277_v31, %v2521_v30  ;;  %v4098_v46 = vpack.c.bf16 %v61_v35, %v56_v34  ;;  %v2809_v19 = vld [vmem:[%s5248_s1 + $0x458] sm:$0xf]  ;;  %v3439_v28 = vld [vmem:[%s5248_s1 + $0x73c] sm:$0xf0]  ;;  %v2785_v33 = vld [vmem:[%s5248_s1 + $0x428] sm:$0xf] }
  0x48   :  { %1689 = vmatpush.bf16.msra.mxu0 %v2974_v62  ;;  %v3001_v21 = vld [vmem:[%s5248_s1 + $0x5d8] sm:$0xf]  ;;  %v2810_v30 = vor.u32 %v3349_v20, %v2809_v19  ;;  %v3343_v34 = vld [vmem:[%s5248_s1 + $0x43c] sm:$0xf0]  ;;  %v3244_v39 = vld [vmem:[%s5248_s1 + $0x12c] sm:$0xf] }
  0x49   :  { %1708 = vmatpush.bf16.msra.mxu1 %v3166_v63  ;;  %v2282_v63 = vor.u32 %v3217_v52, %v2281_v49  ;;  %v2786_v38 = vor.u32 %v3343_v34, %v2785_v33  ;;  %v3433_v42 = vld [vmem:[%s5248_s1 + $0x70c] sm:$0xf0]  ;;  %v2761_v43 = vld [vmem:[%s5248_s1 + $0x3f8] sm:$0xf]  ;;  %v3238_v61 = vld [vmem:[%s5248_s1 + $0xfc] sm:$0xf] }
  0x4a   :  { %1727 = vmatpush.bf16.msra.mxu2 %v2402_v47  ;;  %v3271_v47 = vld [vmem:[%s5248_s1 + $0x1fc] sm:$0xf0]  ;;  %v2953_v52 = vld [vmem:[%s5248_s1 + $0x578] sm:$0xf]  ;;  %v2737_v1 = vld [vmem:[%s5248_s1 + $0x3c8] sm:$0xf] }
  0x4b   :  { %1746 = vmatpush.bf16.msra.mxu3 %v2594_v2  ;;  %v2498_v62 = vor.u32 %v3271_v47, %v2497_v45  ;;  %v2473_v2 = vld [vmem:[%s5248_s1 + $0x1b8] sm:$0xf]  ;;  %v3337_v45 = vld [vmem:[%s5248_s1 + $0x40c] sm:$0xf0]  ;;  %v3427_v0 = vld [vmem:[%s5248_s1 + $0x6dc] sm:$0xf0] }
  0x4c   :  { %1690 = vmatpush.bf16.msra.mxu0 %v2950_v10  ;;  %v3351_v10 = vld [vmem:[%s5248_s1 + $0x484] sm:$0xf]  ;;  %v2762_v60 = vor.u32 %v3337_v45, %v2761_v43  ;;  %v3379_v6 = vld [vmem:[%s5248_s1 + $0x55c] sm:$0xf0]  ;;  %v2905_v17 = vld [vmem:[%s5248_s1 + $0x518] sm:$0xf] }
  0x4d   :  { %1709 = vmatpush.bf16.msra.mxu1 %v3142_v11  ;;  %v2827_v11 = vld [vmem:[%s5248_s1 + $0x498] sm:$0xf0]  ;;  %v3220_v33 = vld [vmem:[%s5248_s1 + $0x6c] sm:$0xf]  ;;  %v2307_v34 = vld [vmem:[%s5248_s1 + $0x80] sm:$0xf0] }
  0x4e   :  { %1728 = vmatpush.bf16.msra.mxu2 %v2378_v3  ;;  %v3265_v3 = vld [vmem:[%s5248_s1 + $0x1cc] sm:$0xf0]  ;;  %v2830_v25 = vor.u32 %v3351_v10, %v2827_v11  ;;  %v2355_v10 = vld [vmem:[%s5248_s1 + $0xe0] sm:$0xf0]  ;;  %v3097_v11 = vld [vmem:[%s5248_s1 + $0x698] sm:$0xf] }
  0x4f   :  { %1747 = vmatpush.bf16.msra.mxu3 %v2570_v14  ;;  %v2474_v13 = vor.u32 %v3265_v3, %v2473_v2  ;;  %v2258_v14 = vor.u32 %v3211_v5, %v2257_v4  ;;  %v3331_v2 = vld [vmem:[%s5248_s1 + $0x3dc] sm:$0xf0]  ;;  %v2929_v5 = vld [vmem:[%s5248_s1 + $0x548] sm:$0xf]  ;;  %v3214_v43 = vld [vmem:[%s5248_s1 + $0x3c] sm:$0xf] }
  0x50   :  { %1691 = vmatpush.bf16.msra.mxu0 %v2926_v22  ;;  %v3397_v22 = vld [vmem:[%s5248_s1 + $0x5ec] sm:$0xf0] }
  0x51   :  { %1710 = vmatpush.bf16.msra.mxu1 %v3118_v23  ;;  %v3250_v23 = vld [vmem:[%s5248_s1 + $0x15c] sm:$0xf]  ;;  %v3002_v31 = vor.u32 %v3397_v22, %v3001_v21  ;;  %v2331_v22 = vld [vmem:[%s5248_s1 + $0xb0] sm:$0xf0] }
  0x52   :  { %1729 = vmatpush.bf16.msra.mxu2 %v2354_v15  ;;  %v3019_v15 = vld [vmem:[%s5248_s1 + $0x618] sm:$0xf0]  ;;  %v2430_v32 = vor.u32 %v3250_v23, %v2427_v24  ;;  %v3073_v23 = vld [vmem:[%s5248_s1 + $0x668] sm:$0xf]  ;;  %v3415_v24 = vld [vmem:[%s5248_s1 + $0x67c] sm:$0xf0] }
  0x53   :  { %1748 = vmatpush.bf16.msra.mxu3 %v2546_v26  ;;  %1625 = vmatmul.bf16.gmra.mxu0 %v4098_v46  ;;  %v3022_v26 = vor.u32 %v3399_v12, %v3019_v15  ;;  %v3421_v12 = vld [vmem:[%s5248_s1 + $0x6ac] sm:$0xf0]  ;;  %v2930_v15 = vor.u32 %v3379_v6, %v2929_v5  ;;  %v3226_v21 = vld [vmem:[%s5248_s1 + $0x9c] sm:$0xf]  ;;  %v3208_v5 = vld [vmem:[%s5248_s1 + $0xc] sm:$0xf] }
  0x54   :  { %1692 = vmatpush.bf16.msra.mxu0 %v2902_v36  ;;  %1644 = vmatmul.bf16.gmra.mxu1 %v3852_v44  ;;  %v2977_v36 = vld [vmem:[%s5248_s1 + $0x5a8] sm:$0xf]  ;;  %v3098_v19 = vor.u32 %v3421_v12, %v3097_v11 }
  0x55   :  { %1711 = vmatpush.bf16.msra.mxu1 %v3094_v37  ;;  %1663 = vmatmul.bf16.gmra.mxu2 %v3863_v50  ;;  %v3391_v37 = vld [vmem:[%s5248_s1 + $0x5bc] sm:$0xf0] }
  0x56   :  { %1730 = vmatpush.bf16.msra.mxu2 %v2330_v27  ;;  %1682 = vmatmul.bf16.gmra.mxu3 %v3865_v51  ;;  %v3169_v27 = vld [vmem:[%s5248_s1 + $0x728] sm:$0xf]  ;;  %v2978_v47 = vor.u32 %v3391_v37, %v2977_v36  ;;  %v3409_v36 = vld [vmem:[%s5248_s1 + $0x64c] sm:$0xf0]  ;;  %v2665_v37 = vld [vmem:[%s5248_s1 + $0x338] sm:$0xf] }
  0x57   :  { %1749 = vmatpush.bf16.msra.mxu3 %v2522_v40  ;;  %v3170_v35 = vor.u32 %v3439_v28, %v3169_v27  ;;  %v2403_v40 = vld [vmem:[%s5248_s1 + $0x140] sm:$0xf0]  ;;  %v2334_v28 = vor.u32 %v3226_v21, %v2331_v22 }
  0x58   :  { %1693 = vmatpush.bf16.msra.mxu0 %v2878_v55  ;;  %v2406_v49 = vor.u32 %v3244_v39, %v2403_v40  ;;  %v3385_v55 = vld [vmem:[%s5248_s1 + $0x58c] sm:$0xf0]  ;;  %v2310_v40 = vor.u32 %v3220_v33, %v2307_v34  ;;  %v3286_v33 = vld [vmem:[%s5248_s1 + $0x27c] sm:$0xf]  ;;  %v2571_v34 = vld [vmem:[%s5248_s1 + $0x290] sm:$0xf0] }
  0x59   :  { %1712 = vmatpush.bf16.msra.mxu1 %v3070_v59  ;;  %v2954_v3 = vor.u32 %v3385_v55, %v2953_v52  ;;  %v3025_v52 = vld [vmem:[%s5248_s1 + $0x608] sm:$0xf]  ;;  %v3403_v55 = vld [vmem:[%s5248_s1 + $0x61c] sm:$0xf0] }
  0x5a   :  { %1731 = vmatpush.bf16.msra.mxu2 %v2306_v41  ;;  %v3145_v41 = vld [vmem:[%s5248_s1 + $0x6f8] sm:$0xf]  ;;  %v3026_v6 = vor.u32 %v3403_v55, %v3025_v52  ;;  %v3328_v52 = vld [vmem:[%s5248_s1 + $0x3cc] sm:$0xf]  ;;  %v2739_v55 = vld [vmem:[%s5248_s1 + $0x3e0] sm:$0xf0] }
  0x5b   :  { %1750 = vmatpush.bf16.msra.mxu3 %v2498_v62  ;;  %v3146_v59 = vor.u32 %v3433_v42, %v3145_v41  ;;  %v2379_v62 = vld [vmem:[%s5248_s1 + $0x110] sm:$0xf0]  ;;  %v2857_v41 = vld [vmem:[%s5248_s1 + $0x4b8] sm:$0xf]  ;;  %v3361_v42 = vld [vmem:[%s5248_s1 + $0x4cc] sm:$0xf0] }
  0x5c   :  { %1694 = vmatpush.bf16.msra.mxu0 %v2854_v8  ;;  %v2382_v4 = vor.u32 %v3238_v61, %v2379_v62  ;;  %v2738_v8 = vor.u32 %v3331_v2, %v2737_v1  ;;  %v3394_v61 = vld [vmem:[%s5248_s1 + $0x5dc] sm:$0xf]  ;;  %v3003_v62 = vld [vmem:[%s5248_s1 + $0x5f0] sm:$0xf0]  ;;  %v2858_v1 = vor.u32 %v3361_v42, %v2857_v41  ;;  %v3376_v41 = vld [vmem:[%s5248_s1 + $0x54c] sm:$0xf] }
  0x5d   :  { %1713 = vmatpush.bf16.msra.mxu1 %v3046_v9  ;;  %v3232_v9 = vld [vmem:[%s5248_s1 + $0xcc] sm:$0xf]  ;;  %v3006_v11 = vor.u32 %v3394_v61, %v3003_v62  ;;  %v2931_v42 = vld [vmem:[%s5248_s1 + $0x560] sm:$0xf0] }
  0x5e   :  { %1732 = vmatpush.bf16.msra.mxu2 %v2282_v63  ;;  %v3121_v63 = vld [vmem:[%s5248_s1 + $0x6c8] sm:$0xf]  ;;  %v2358_v16 = vor.u32 %v3232_v9, %v2355_v10  ;;  %v3346_v9 = vld [vmem:[%s5248_s1 + $0x45c] sm:$0xf]  ;;  %v2811_v10 = vld [vmem:[%s5248_s1 + $0x470] sm:$0xf0]  ;;  %v2934_v61 = vor.u32 %v3376_v41, %v2931_v42 }
  0x5f   :  { %1751 = vmatpush.bf16.msra.mxu3 %v2474_v13  ;;  %v3122_v7 = vor.u32 %v3427_v0, %v3121_v63  ;;  %v2713_v13 = vld [vmem:[%s5248_s1 + $0x398] sm:$0xf]  ;;  %v3298_v63 = vld [vmem:[%s5248_s1 + $0x2dc] sm:$0xf]  ;;  %v2619_v0 = vld [vmem:[%s5248_s1 + $0x2f0] sm:$0xf0]  ;;  %v2814_v21 = vor.u32 %v3346_v9, %v2811_v10 }
  0x60   :  { %1695 = vmatpush.bf16.msra.mxu0 %v2830_v25  ;;  %v2689_v25 = vld [vmem:[%s5248_s1 + $0x368] sm:$0xf]  ;;  %v2622_v12 = vor.u32 %v3298_v63, %v2619_v0  ;;  %v3370_v63 = vld [vmem:[%s5248_s1 + $0x51c] sm:$0xf]  ;;  %v2907_v0 = vld [vmem:[%s5248_s1 + $0x530] sm:$0xf0] }
  0x61   :  { %1714 = vmatpush.bf16.msra.mxu1 %v3022_v26  ;;  %v3319_v26 = vld [vmem:[%s5248_s1 + $0x37c] sm:$0xf0]  ;;  %v2910_v9 = vor.u32 %v3370_v63, %v2907_v0  ;;  %v3304_v41 = vld [vmem:[%s5248_s1 + $0x30c] sm:$0xf]  ;;  %v2643_v42 = vld [vmem:[%s5248_s1 + $0x320] sm:$0xf0] }
  0x62   :  { %1733 = vmatpush.bf16.msra.mxu2 %v2258_v14  ;;  %v3325_v14 = vld [vmem:[%s5248_s1 + $0x3ac] sm:$0xf0]  ;;  %v3009_v63 = vld [vmem:[%s5248_s1 + $0x5e0] sm:$0xf]  ;;  %v3398_v0 = vld [vmem:[%s5248_s1 + $0x5f4] sm:$0xf0] }
  0x63   :  { %1752 = vmatpush.bf16.msra.mxu3 %v2450_v29  ;;  %1696 = vmatmul.bf16.vlgmr.msra.gmra.mxu0 %v3741_v57  ;;  %v2714_v20 = vor.u32 %v3325_v14, %v2713_v13  ;;  %v2881_v29 = vld [vmem:[%s5248_s1 + $0x4e8] sm:$0xf]  ;;  %v3442_v13 = vld [vmem:[%s5248_s1 + $0x75c] sm:$0xf]  ;;  %v3195_v14 = vld [vmem:[%s5248_s1 + $0x770] sm:$0xf0] }
  0x64   :  { %1764 = vmatpush.bf16.msrb.mxu0 %v2810_v30  ;;  %1715 = vmatmul.bf16.vlgmr.msra.gmra.mxu1 %v3990_v58  ;;  %v3367_v30 = vld [vmem:[%s5248_s1 + $0x4fc] sm:$0xf0]  ;;  %v3198_v22 = vor.u32 %v3442_v13, %v3195_v14 }
  0x65   :  { %1783 = vmatpush.bf16.msrb.mxu1 %v3002_v31  ;;  %1734 = vmatmul.bf16.vlgmr.msra.gmra.mxu2 %v3720_v48  ;;  %v3074_v31 = vor.u32 %v3415_v24, %v3073_v23  ;;  %v2882_v39 = vor.u32 %v3367_v30, %v2881_v29  ;;  %v3340_v23 = vld [vmem:[%s5248_s1 + $0x42c] sm:$0xf]  ;;  %v3382_v29 = vld [vmem:[%s5248_s1 + $0x57c] sm:$0xf]  ;;  %v2955_v30 = vld [vmem:[%s5248_s1 + $0x590] sm:$0xf0] }
  0x66   :  { %1802 = vmatpush.bf16.msrb.mxu2 %v3194_v18  ;;  %1753 = vmatmul.bf16.vlgmr.msra.gmra.mxu3 %v3731_v53  ;;  %v3373_v18 = vld [vmem:[%s5248_s1 + $0x52c] sm:$0xf0] }
  0x67   :  { %1821 = vmatpush.bf16.msrb.mxu3 %v2430_v32  ;;  %v2906_v27 = vor.u32 %v3373_v18, %v2905_v17  ;;  %v2690_v32 = vor.u32 %v3319_v26, %v2689_v25  ;;  %v3292_v17 = vld [vmem:[%s5248_s1 + $0x2ac] sm:$0xf]  ;;  %v2595_v18 = vld [vmem:[%s5248_s1 + $0x2c0] sm:$0xf0] }
  0x68   :  { %1765 = vmatpush.bf16.msrb.mxu0 %v2786_v38  ;;  %v3313_v38 = vld [vmem:[%s5248_s1 + $0x34c] sm:$0xf0]  ;;  %v2598_v25 = vor.u32 %v3292_v17, %v2595_v18  ;;  %v2787_v26 = vld [vmem:[%s5248_s1 + $0x440] sm:$0xf0]  ;;  %v3316_v17 = vld [vmem:[%s5248_s1 + $0x36c] sm:$0xf] }
  0x69   :  { %1784 = vmatpush.bf16.msrb.mxu1 %v2978_v47  ;;  %v2666_v47 = vor.u32 %v3313_v38, %v2665_v37  ;;  %v3430_v37 = vld [vmem:[%s5248_s1 + $0x6fc] sm:$0xf]  ;;  %v3147_v38 = vld [vmem:[%s5248_s1 + $0x710] sm:$0xf0]  ;;  %v2691_v18 = vld [vmem:[%s5248_s1 + $0x380] sm:$0xf0] }
  0x6a   :  { %1803 = vmatpush.bf16.msrb.mxu2 %v3170_v35  ;;  %v3049_v35 = vld [vmem:[%s5248_s1 + $0x638] sm:$0xf] }
  0x6b   :  { %1822 = vmatpush.bf16.msrb.mxu3 %v2406_v49  ;;  %v3050_v45 = vor.u32 %v3409_v36, %v3049_v35  ;;  %v2283_v49 = vld [vmem:[%s5248_s1 + $0x50] sm:$0xf0]  ;;  %v3334_v35 = vld [vmem:[%s5248_s1 + $0x3fc] sm:$0xf] }
  0x6c   :  { %1766 = vmatpush.bf16.msrb.mxu0 %v2762_v60  ;;  %v3307_v60 = vld [vmem:[%s5248_s1 + $0x31c] sm:$0xf0]  ;;  %v2286_v2 = vor.u32 %v3214_v43, %v2283_v49  ;;  %v2763_v36 = vld [vmem:[%s5248_s1 + $0x410] sm:$0xf0]  ;;  %v2547_v49 = vld [vmem:[%s5248_s1 + $0x260] sm:$0xf0] }
  0x6d   :  { %1785 = vmatpush.bf16.msrb.mxu1 %v2954_v3  ;;  %v2833_v3 = vld [vmem:[%s5248_s1 + $0x488] sm:$0xf]  ;;  %v2766_v43 = vor.u32 %v3334_v35, %v2763_v36  ;;  %v2835_v36 = vld [vmem:[%s5248_s1 + $0x4a0] sm:$0xf0] }
  0x6e   :  { %1804 = vmatpush.bf16.msrb.mxu2 %v3146_v59  ;;  %v2641_v59 = vld [vmem:[%s5248_s1 + $0x308] sm:$0xf] }
  0x6f   :  { %1823 = vmatpush.bf16.msrb.mxu3 %v2382_v4  ;;  %v3355_v4 = vld [vmem:[%s5248_s1 + $0x49c] sm:$0xf0] }
  0x70   :  { %1767 = vmatpush.bf16.msrb.mxu0 %v2738_v8  ;;  %v2259_v8 = vld [vmem:[%s5248_s1 + $0x20] sm:$0xf0] }
  0x71   :  { %1786 = vmatpush.bf16.msrb.mxu1 %v2930_v15  ;;  %v3388_v15 = vld [vmem:[%s5248_s1 + $0x5ac] sm:$0xf] }
  0x72   :  { %1805 = vmatpush.bf16.msrb.mxu2 %v3122_v7  ;;  %v2642_v7 = vor.u32 %v3307_v60, %v2641_v59  ;;  %v3424_v59 = vld [vmem:[%s5248_s1 + $0x6cc] sm:$0xf]  ;;  %v3123_v60 = vld [vmem:[%s5248_s1 + $0x6e0] sm:$0xf0] }
  0x73   :  { %1824 = vmatpush.bf16.msrb.mxu3 %v2358_v16  ;;  %1701 = vmatmul.bf16.gmra.mxu0 %v3873_v56  ;;  %v2979_v16 = vld [vmem:[%s5248_s1 + $0x5c0] sm:$0xf0] }
  0x74   :  { %1768 = vmatpush.bf16.msrb.mxu0 %v2714_v20  ;;  %1720 = vmatmul.bf16.gmra.mxu1 %v4098_v46  ;;  %v2262_v20 = vor.u32 %v3208_v5, %v2259_v8  ;;  %v2982_v24 = vor.u32 %v3388_v15, %v2979_v16  ;;  %v3322_v5 = vld [vmem:[%s5248_s1 + $0x39c] sm:$0xf]  ;;  %v3099_v8 = vld [vmem:[%s5248_s1 + $0x6b0] sm:$0xf0]  ;;  %v3268_v15 = vld [vmem:[%s5248_s1 + $0x1ec] sm:$0xf] }
  0x75   :  { %1787 = vmatpush.bf16.msrb.mxu1 %v2906_v27  ;;  %1739 = vmatmul.bf16.gmra.mxu2 %v3852_v44  ;;  %v3436_v27 = vld [vmem:[%s5248_s1 + $0x72c] sm:$0xf]  ;;  %v2499_v16 = vld [vmem:[%s5248_s1 + $0x200] sm:$0xf0] }
  0x76   :  { %1806 = vmatpush.bf16.msrb.mxu2 %v3098_v19  ;;  %1758 = vmatmul.bf16.gmra.mxu3 %v3863_v50  ;;  %v2834_v19 = vor.u32 %v3355_v4, %v2833_v3  ;;  %v3274_v3 = vld [vmem:[%s5248_s1 + $0x21c] sm:$0xf]  ;;  %v2523_v4 = vld [vmem:[%s5248_s1 + $0x230] sm:$0xf0] }
  0x77   :  { %1825 = vmatpush.bf16.msrb.mxu3 %v2334_v28  ;;  %v3171_v28 = vld [vmem:[%s5248_s1 + $0x740] sm:$0xf0]  ;;  %v2526_v10 = vor.u32 %v3274_v3, %v2523_v4 }
  0x78   :  { %1769 = vmatpush.bf16.msrb.mxu0 %v2690_v32  ;;  %v3174_v32 = vor.u32 %v3436_v27, %v3171_v28  ;;  %v3262_v27 = vld [vmem:[%s5248_s1 + $0x1bc] sm:$0xf]  ;;  %v2475_v28 = vld [vmem:[%s5248_s1 + $0x1d0] sm:$0xf0] }
  0x79   :  { %1788 = vmatpush.bf16.msrb.mxu1 %v2882_v39  ;;  %v2958_v39 = vor.u32 %v3382_v29, %v2955_v30  ;;  %v3310_v29 = vld [vmem:[%s5248_s1 + $0x33c] sm:$0xf]  ;;  %v2667_v30 = vld [vmem:[%s5248_s1 + $0x350] sm:$0xf0]  ;;  %v2478_v35 = vor.u32 %v3262_v27, %v2475_v28  ;;  %v3386_v27 = vld [vmem:[%s5248_s1 + $0x594] sm:$0xf0] }
  0x7a   :  { %1807 = vmatpush.bf16.msrb.mxu2 %v3074_v31  ;;  %v2790_v31 = vor.u32 %v3340_v23, %v2787_v26  ;;  %v3358_v23 = vld [vmem:[%s5248_s1 + $0x4bc] sm:$0xf] }
  0x7b   :  { %1826 = vmatpush.bf16.msrb.mxu3 %v2310_v40  ;;  %v2574_v40 = vor.u32 %v3286_v33, %v2571_v34  ;;  %v3352_v33 = vld [vmem:[%s5248_s1 + $0x48c] sm:$0xf] }
  0x7c   :  { %1770 = vmatpush.bf16.msrb.mxu0 %v2666_v47  ;;  %v3280_v47 = vld [vmem:[%s5248_s1 + $0x24c] sm:$0xf] }
  0x7d   :  { %1789 = vmatpush.bf16.msrb.mxu1 %v2858_v1  ;;  %v2550_v62 = vor.u32 %v3280_v47, %v2547_v49  ;;  %v2742_v1 = vor.u32 %v3328_v52, %v2739_v55  ;;  %v2817_v47 = vld [vmem:[%s5248_s1 + $0x460] sm:$0xf]  ;;  %v3350_v49 = vld [vmem:[%s5248_s1 + $0x474] sm:$0xf0] }
  0x7e   :  { %1808 = vmatpush.bf16.msrb.mxu2 %v3050_v45  ;;  %v3150_v45 = vor.u32 %v3430_v37, %v3147_v38  ;;  %v3256_v37 = vld [vmem:[%s5248_s1 + $0x18c] sm:$0xf]  ;;  %v2451_v38 = vld [vmem:[%s5248_s1 + $0x1a0] sm:$0xf0]  ;;  %v2433_v52 = vld [vmem:[%s5248_s1 + $0x160] sm:$0xf]  ;;  %v2818_v3 = vor.u32 %v3350_v49, %v2817_v47 }
  0x7f   :  { %1827 = vmatpush.bf16.msrb.mxu3 %v2286_v2  ;;  %v3126_v2 = vor.u32 %v3424_v59, %v3123_v60  ;;  %v3254_v55 = vld [vmem:[%s5248_s1 + $0x174] sm:$0xf0]  ;;  %v2625_v59 = vld [vmem:[%s5248_s1 + $0x2e0] sm:$0xf]  ;;  %v2838_v60 = vor.u32 %v3352_v33, %v2835_v36  ;;  %v3236_v36 = vld [vmem:[%s5248_s1 + $0xe4] sm:$0xf0] }
  0x80   :  { %1771 = vmatpush.bf16.msrb.mxu0 %v2642_v7  ;;  %v3418_v7 = vld [vmem:[%s5248_s1 + $0x69c] sm:$0xf]  ;;  %v2434_v4 = vor.u32 %v3254_v55, %v2433_v52  ;;  %v2337_v55 = vld [vmem:[%s5248_s1 + $0xa0] sm:$0xf] }
  0x81   :  { %1790 = vmatpush.bf16.msrb.mxu1 %v2834_v19  ;;  %v3102_v14 = vor.u32 %v3418_v7, %v3099_v8  ;;  %v3412_v19 = vld [vmem:[%s5248_s1 + $0x66c] sm:$0xf]  ;;  %v3010_v8 = vor.u32 %v3398_v0, %v3009_v63  ;;  %v3278_v63 = vld [vmem:[%s5248_s1 + $0x234] sm:$0xf0]  ;;  %v2913_v0 = vld [vmem:[%s5248_s1 + $0x520] sm:$0xf] }
  0x82   :  { %1809 = vmatpush.bf16.msrb.mxu2 %v3026_v6  ;;  %v2715_v6 = vld [vmem:[%s5248_s1 + $0x3b0] sm:$0xf0] }
  0x83   :  { %1828 = vmatpush.bf16.msrb.mxu3 %v2262_v20  ;;  %1772 = vmatmul.bf16.vlgmr.msrb.gmra.mxu0 %v3733_v54  ;;  %v2718_v13 = vor.u32 %v3322_v5, %v2715_v6  ;;  %v3075_v20 = vld [vmem:[%s5248_s1 + $0x680] sm:$0xf0]  ;;  %v2793_v5 = vld [vmem:[%s5248_s1 + $0x430] sm:$0xf]  ;;  %v3344_v6 = vld [vmem:[%s5248_s1 + $0x444] sm:$0xf0] }
  0x84   :  { %1840 = vmatpush.bf16.msra.mxu0 %v2622_v12  ;;  %1791 = vmatmul.bf16.vlgmr.msrb.gmra.mxu1 %v3741_v57  ;;  %v2883_v12 = vld [vmem:[%s5248_s1 + $0x500] sm:$0xf0]  ;;  %v3078_v26 = vor.u32 %v3412_v19, %v3075_v20  ;;  %v2769_v19 = vld [vmem:[%s5248_s1 + $0x400] sm:$0xf]  ;;  %v3338_v20 = vld [vmem:[%s5248_s1 + $0x414] sm:$0xf0] }
  0x85   :  { %1859 = vmatpush.bf16.msra.mxu1 %v2814_v21  ;;  %1810 = vmatmul.bf16.vlgmr.msrb.gmra.mxu2 %v3990_v58 }
  0x86   :  { %1878 = vmatpush.bf16.msra.mxu2 %v3006_v11  ;;  %1829 = vmatmul.bf16.vlgmr.msrb.gmra.mxu3 %v3720_v48  ;;  %v3364_v11 = vld [vmem:[%s5248_s1 + $0x4ec] sm:$0xf] }
  0x87   :  { %1897 = vmatpush.bf16.msra.mxu3 %v3198_v22  ;;  %v2886_v21 = vor.u32 %v3364_v11, %v2883_v12  ;;  %v2502_v22 = vor.u32 %v3268_v15, %v2499_v16  ;;  %v2601_v11 = vld [vmem:[%s5248_s1 + $0x2b0] sm:$0xf]  ;;  %v3296_v12 = vld [vmem:[%s5248_s1 + $0x2c4] sm:$0xf0]  ;;  %v2794_v15 = vor.u32 %v3344_v6, %v2793_v5 }
  0x88   :  { %1841 = vmatpush.bf16.msra.mxu0 %v2598_v25  ;;  %v2694_v25 = vor.u32 %v3316_v17, %v2691_v18  ;;  %v2602_v17 = vor.u32 %v3296_v12, %v2601_v11  ;;  %v2697_v5 = vld [vmem:[%s5248_s1 + $0x370] sm:$0xf]  ;;  %v3320_v6 = vld [vmem:[%s5248_s1 + $0x384] sm:$0xf0] }
  0x89   :  { %1860 = vmatpush.bf16.msra.mxu1 %v2790_v31  ;;  %v3406_v31 = vld [vmem:[%s5248_s1 + $0x63c] sm:$0xf]  ;;  %v2505_v11 = vld [vmem:[%s5248_s1 + $0x1f0] sm:$0xf]  ;;  %v3272_v12 = vld [vmem:[%s5248_s1 + $0x204] sm:$0xf0] }
  0x8a   :  { %1879 = vmatpush.bf16.msra.mxu2 %v2982_v24  ;;  %v2859_v24 = vld [vmem:[%s5248_s1 + $0x4d0] sm:$0xf0] }
  0x8b   :  { %1898 = vmatpush.bf16.msra.mxu3 %v3174_v32  ;;  %v3051_v32 = vld [vmem:[%s5248_s1 + $0x650] sm:$0xf0]  ;;  %v2862_v34 = vor.u32 %v3358_v23, %v2859_v24  ;;  %v2577_v23 = vld [vmem:[%s5248_s1 + $0x280] sm:$0xf] }
  0x8c   :  { %1842 = vmatpush.bf16.msra.mxu0 %v2574_v40  ;;  %v3054_v40 = vor.u32 %v3406_v31, %v3051_v32  ;;  %v2745_v31 = vld [vmem:[%s5248_s1 + $0x3d0] sm:$0xf]  ;;  %v3332_v32 = vld [vmem:[%s5248_s1 + $0x3e4] sm:$0xf0] }
  0x8d   :  { %1861 = vmatpush.bf16.msra.mxu1 %v2766_v43  ;;  %v3400_v43 = vld [vmem:[%s5248_s1 + $0x60c] sm:$0xf] }
  0x8e   :  { %1880 = vmatpush.bf16.msra.mxu2 %v2958_v39  ;;  %v2670_v39 = vor.u32 %v3310_v29, %v2667_v30  ;;  %v2770_v29 = vor.u32 %v3338_v20, %v2769_v19  ;;  %v2506_v20 = vor.u32 %v3272_v12, %v2505_v11 }
  0x8f   :  { %1899 = vmatpush.bf16.msra.mxu3 %v3150_v45  ;;  %v3027_v45 = vld [vmem:[%s5248_s1 + $0x620] sm:$0xf0] }
  0x90   :  { %1843 = vmatpush.bf16.msra.mxu0 %v2550_v62  ;;  %v3302_v62 = vld [vmem:[%s5248_s1 + $0x2f4] sm:$0xf0] }
  0x91   :  { %1862 = vmatpush.bf16.msra.mxu1 %v2742_v1  ;;  %v2646_v1 = vor.u32 %v3304_v41, %v2643_v42  ;;  %v2626_v7 = vor.u32 %v3302_v62, %v2625_v59  ;;  %v2746_v41 = vor.u32 %v3332_v32, %v2745_v31  ;;  %v3230_v59 = vld [vmem:[%s5248_s1 + $0xb4] sm:$0xf0] }
  0x92   :  { %1881 = vmatpush.bf16.msra.mxu2 %v2934_v61  ;;  %v2454_v61 = vor.u32 %v3256_v37, %v2451_v38  ;;  %v2553_v37 = vld [vmem:[%s5248_s1 + $0x250] sm:$0xf]  ;;  %v3284_v38 = vld [vmem:[%s5248_s1 + $0x264] sm:$0xf0]  ;;  %v3362_v31 = vld [vmem:[%s5248_s1 + $0x4d4] sm:$0xf0] }
  0x93   :  { %1900 = vmatpush.bf16.msra.mxu3 %v3126_v2  ;;  %1777 = vmatmul.bf16.gmra.mxu0 %v3865_v51  ;;  %v3030_v2 = vor.u32 %v3400_v43, %v3027_v45  ;;  %v2721_v43 = vld [vmem:[%s5248_s1 + $0x3a0] sm:$0xf]  ;;  %v3326_v45 = vld [vmem:[%s5248_s1 + $0x3b4] sm:$0xf0]  ;;  %v2554_v49 = vor.u32 %v3284_v38, %v2553_v37  ;;  %v2265_v37 = vld [vmem:[%s5248_s1 + $0x10] sm:$0xf] }
  0x94   :  { %1844 = vmatpush.bf16.msra.mxu0 %v2526_v10  ;;  %1796 = vmatmul.bf16.gmra.mxu1 %v3873_v56  ;;  %v3248_v10 = vld [vmem:[%s5248_s1 + $0x144] sm:$0xf0] }
  0x95   :  { %1863 = vmatpush.bf16.msra.mxu1 %v2718_v13  ;;  %1815 = vmatmul.bf16.gmra.mxu2 %v4098_v46  ;;  %v2985_v13 = vld [vmem:[%s5248_s1 + $0x5b0] sm:$0xf]  ;;  %v3212_v38 = vld [vmem:[%s5248_s1 + $0x24] sm:$0xf0] }
  0x96   :  { %1882 = vmatpush.bf16.msra.mxu2 %v2910_v9  ;;  %1834 = vmatmul.bf16.gmra.mxu3 %v3852_v44  ;;  %v2409_v9 = vld [vmem:[%s5248_s1 + $0x130] sm:$0xf] }
  0x97   :  { %1901 = vmatpush.bf16.msra.mxu3 %v3102_v14  ;;  %v3392_v14 = vld [vmem:[%s5248_s1 + $0x5c4] sm:$0xf0]  ;;  %v2410_v16 = vor.u32 %v3248_v10, %v2409_v9  ;;  %v2313_v9 = vld [vmem:[%s5248_s1 + $0x70] sm:$0xf] }
  0x98   :  { %1845 = vmatpush.bf16.msra.mxu0 %v2502_v22  ;;  %v2986_v18 = vor.u32 %v3392_v14, %v2985_v13  ;;  %v3242_v22 = vld [vmem:[%s5248_s1 + $0x114] sm:$0xf0]  ;;  %v3224_v10 = vld [vmem:[%s5248_s1 + $0x84] sm:$0xf0]  ;;  %v2889_v13 = vld [vmem:[%s5248_s1 + $0x4f0] sm:$0xf] }
  0x99   :  { %1864 = vmatpush.bf16.msra.mxu1 %v2694_v25  ;;  %v3290_v25 = vld [vmem:[%s5248_s1 + $0x294] sm:$0xf0]  ;;  %v3368_v14 = vld [vmem:[%s5248_s1 + $0x504] sm:$0xf0] }
  0x9a   :  { %1883 = vmatpush.bf16.msra.mxu2 %v2886_v21  ;;  %v2385_v21 = vld [vmem:[%s5248_s1 + $0x100] sm:$0xf]  ;;  %v2578_v33 = vor.u32 %v3290_v25, %v2577_v23  ;;  %v3218_v23 = vld [vmem:[%s5248_s1 + $0x54] sm:$0xf0] }
  0x9b   :  { %1902 = vmatpush.bf16.msra.mxu3 %v3078_v26  ;;  %v2961_v26 = vld [vmem:[%s5248_s1 + $0x580] sm:$0xf]  ;;  %v2386_v30 = vor.u32 %v3242_v22, %v2385_v21  ;;  %v2890_v21 = vor.u32 %v3368_v14, %v2889_v13  ;;  %v3293_v13 = vld [vmem:[%s5248_s1 + $0x2b4] sm:$0xf]  ;;  %v2603_v14 = vld [vmem:[%s5248_s1 + $0x2c8] sm:$0xf0] }
  0x9c   :  { %1846 = vmatpush.bf16.msra.mxu0 %v2478_v35  ;;  %v2361_v35 = vld [vmem:[%s5248_s1 + $0xd0] sm:$0xf]  ;;  %v2289_v22 = vld [vmem:[%s5248_s1 + $0x40] sm:$0xf] }
  0x9d   :  { %1865 = vmatpush.bf16.msra.mxu1 %v2670_v39  ;;  %v2937_v39 = vld [vmem:[%s5248_s1 + $0x550] sm:$0xf]  ;;  %v2362_v42 = vor.u32 %v3236_v36, %v2361_v35  ;;  %v2481_v25 = vld [vmem:[%s5248_s1 + $0x1c0] sm:$0xf]  ;;  %v2290_v35 = vor.u32 %v3218_v23, %v2289_v22  ;;  %v3308_v36 = vld [vmem:[%s5248_s1 + $0x324] sm:$0xf0] }
  0x9e   :  { %1884 = vmatpush.bf16.msra.mxu2 %v2862_v34  ;;  %v2962_v34 = vor.u32 %v3386_v27, %v2961_v26  ;;  %v2795_v22 = vld [vmem:[%s5248_s1 + $0x448] sm:$0xf0]  ;;  %v4836_v23 = vld [vmem:[%s5250_s2] sm:$0x3f] }
  0x9f   :  { %1903 = vmatpush.bf16.msra.mxu3 %v3054_v40  ;;  %v3380_v40 = vld [vmem:[%s5248_s1 + $0x564] sm:$0xf0] }
  0xa0   :  { %1847 = vmatpush.bf16.msra.mxu0 %v2454_v61  ;;  %v4618_v24 = vpop.f32.mrf.mxu0  ;;  %v2938_v52 = vor.u32 %v3380_v40, %v2937_v39 }
  0xa1   :  { %1866 = vmatpush.bf16.msra.mxu1 %v2646_v1  ;;  %v4629_v28 = vpop.f32.mrf.mxu1  ;;  %v3374_v1 = vld [vmem:[%s5248_s1 + $0x534] sm:$0xf0] }
  0xa2   :  { %1885 = vmatpush.bf16.msra.mxu2 %v2838_v60  ;;  %v2529_v60 = vld [vmem:[%s5248_s1 + $0x220] sm:$0xf] }
  0xa3   :  { %1904 = vmatpush.bf16.msra.mxu3 %v3030_v2  ;;  %1848 = vmatmul.bf16.vlgmr.msra.gmra.mxu0 %v3731_v53 }
  0xa4   :  { %1916 = vmatpush.bf16.msrb.mxu0 %v2434_v4  ;;  %1867 = vmatmul.bf16.vlgmr.msra.gmra.mxu1 %v3733_v54  ;;  %v2338_v4 = vor.u32 %v3230_v59, %v2337_v55  ;;  %v3201_v55 = vld [vmem:[%s5248_s1 + $0x760] sm:$0xf]  ;;  %v3446_v59 = vld [vmem:[%s5248_s1 + $0x774] sm:$0xf0] }
  0xa5   :  { %1935 = vmatpush.bf16.msrb.mxu1 %v2626_v7  ;;  %1886 = vmatmul.bf16.vlgmr.msra.gmra.mxu2 %v3741_v57  ;;  %v2530_v7 = vor.u32 %v3278_v63, %v2529_v60  ;;  %v3251_v60 = vld [vmem:[%s5248_s1 + $0x164] sm:$0xf]  ;;  %v3202_v12 = vor.u32 %v3446_v59, %v3201_v55 }
  0xa6   :  { %1954 = vmatpush.bf16.msrb.mxu2 %v2818_v3  ;;  %1905 = vmatmul.bf16.vlgmr.msra.gmra.mxu3 %v3990_v58  ;;  %v2722_v3 = vor.u32 %v3326_v45, %v2721_v43  ;;  %v2841_v43 = vld [vmem:[%s5248_s1 + $0x490] sm:$0xf]  ;;  %v3356_v45 = vld [vmem:[%s5248_s1 + $0x4a4] sm:$0xf0] }
  0xa7   :  { %1973 = vmatpush.bf16.msrb.mxu3 %v3010_v8  ;;  %v2914_v8 = vor.u32 %v3374_v1, %v2913_v0  ;;  %v2266_v0 = vor.u32 %v3212_v38, %v2265_v37  ;;  %v2435_v1 = vld [vmem:[%s5248_s1 + $0x178] sm:$0xf0]  ;;  %v3153_v37 = vld [vmem:[%s5248_s1 + $0x700] sm:$0xf]  ;;  %v3434_v38 = vld [vmem:[%s5248_s1 + $0x714] sm:$0xf0] }
  0xa8   :  { %1917 = vmatpush.bf16.msrb.mxu0 %v2410_v16  ;;  %v4665_v47 = vpop.f32.mrf.mxu2  ;;  %v4678_v62 = vpop.f32.mrf.mxu0  ;;  %v2314_v16 = vor.u32 %v3224_v10, %v2313_v9 }
  0xa9   :  { %1936 = vmatpush.bf16.msrb.mxu1 %v2602_v17  ;;  %v4676_v61 = vpop.f32.mrf.mxu3  ;;  %v4689_v2 = vpop.f32.mrf.mxu1  ;;  %v2673_v17 = vld [vmem:[%s5248_s1 + $0x340] sm:$0xf] }
  0xaa   :  { %1955 = vmatpush.bf16.msrb.mxu2 %v2794_v15  ;;  %v2698_v15 = vor.u32 %v3320_v6, %v2697_v5 }
  0xab   :  { %1974 = vmatpush.bf16.msrb.mxu3 %v2986_v18  ;;  %v3314_v18 = vld [vmem:[%s5248_s1 + $0x354] sm:$0xf0] }
  0xac   :  { %1918 = vmatpush.bf16.msrb.mxu0 %v2386_v30  ;;  %v2865_v30 = vld [vmem:[%s5248_s1 + $0x4c0] sm:$0xf] }
  0xad   :  { %1937 = vmatpush.bf16.msrb.mxu1 %v2578_v33  ;;  %v2649_v33 = vld [vmem:[%s5248_s1 + $0x310] sm:$0xf]  ;;  %v2866_v40 = vor.u32 %v3362_v31, %v2865_v30 }
  0xae   :  { %1956 = vmatpush.bf16.msrb.mxu2 %v2770_v29  ;;  %v3266_v29 = vld [vmem:[%s5248_s1 + $0x1d4] sm:$0xf0]  ;;  %v2650_v63 = vor.u32 %v3308_v36, %v2649_v33  ;;  %v2579_v36 = vld [vmem:[%s5248_s1 + $0x298] sm:$0xf0] }
  0xaf   :  { %1975 = vmatpush.bf16.msrb.mxu3 %v2962_v34  ;;  %v2674_v34 = vor.u32 %v3314_v18, %v2673_v17  ;;  %v2482_v39 = vor.u32 %v3266_v29, %v2481_v25  ;;  %v3245_v18 = vld [vmem:[%s5248_s1 + $0x134] sm:$0xf]  ;;  %v2606_v29 = vor.u32 %v3293_v13, %v2603_v14  ;;  %v3275_v14 = vld [vmem:[%s5248_s1 + $0x224] sm:$0xf] }
  0xb0   :  { %1919 = vmatpush.bf16.msrb.mxu0 %v2362_v42  ;;  %v4721_v19 = vpop.f32.mrf.mxu2  ;;  %v4734_v27 = vpop.f32.mrf.mxu0  ;;  %v3260_v42 = vld [vmem:[%s5248_s1 + $0x1a4] sm:$0xf0] }
  0xb1   :  { %1938 = vmatpush.bf16.msrb.mxu1 %v2554_v49  ;;  %v4732_v26 = vpop.f32.mrf.mxu3  ;;  %v4745_v32 = vpop.f32.mrf.mxu1  ;;  %v3299_v49 = vld [vmem:[%s5248_s1 + $0x2e4] sm:$0xf] }
  0xb2   :  { %1957 = vmatpush.bf16.msrb.mxu2 %v2746_v41  ;;  %v2457_v41 = vld [vmem:[%s5248_s1 + $0x190] sm:$0xf] }
  0xb3   :  { %1976 = vmatpush.bf16.msrb.mxu3 %v2938_v52  ;;  %1853 = vmatmul.bf16.gmra.mxu0 %v3863_v50  ;;  %v2627_v52 = vld [vmem:[%s5248_s1 + $0x2f8] sm:$0xf0]  ;;  %v2458_v6 = vor.u32 %v3260_v42, %v2457_v41 }
  0xb4   :  { %1920 = vmatpush.bf16.msrb.mxu0 %v2338_v4  ;;  %1872 = vmatmul.bf16.gmra.mxu1 %v3865_v51  ;;  %v2819_v4 = vld [vmem:[%s5248_s1 + $0x478] sm:$0xf0]  ;;  %v2630_v11 = vor.u32 %v3299_v49, %v2627_v52 }
  0xb5   :  { %1939 = vmatpush.bf16.msrb.mxu1 %v2530_v7  ;;  %1891 = vmatmul.bf16.gmra.mxu2 %v3873_v56  ;;  %v2842_v7 = vor.u32 %v3356_v45, %v2841_v43  ;;  %v2387_v42 = vld [vmem:[%s5248_s1 + $0x118] sm:$0xf0]  ;;  %v3335_v43 = vld [vmem:[%s5248_s1 + $0x404] sm:$0xf] }
  0xb6   :  { %1958 = vmatpush.bf16.msrb.mxu2 %v2722_v3  ;;  %1910 = vmatmul.bf16.gmra.mxu3 %v4098_v46  ;;  %v3347_v3 = vld [vmem:[%s5248_s1 + $0x464] sm:$0xf]  ;;  %v2771_v45 = vld [vmem:[%s5248_s1 + $0x418] sm:$0xf0] }
  0xb7   :  { %1977 = vmatpush.bf16.msrb.mxu3 %v2914_v8  ;;  %v1565_v8 = vadd.f32 %v4629_v28, %v4618_v24  ;;  %v2822_v17 = vor.u32 %v3347_v3, %v2819_v4  ;;  %v3177_v24 = vld [vmem:[%s5248_s1 + $0x730] sm:$0xf]  ;;  %v3440_v28 = vld [vmem:[%s5248_s1 + $0x744] sm:$0xf0]  ;;  %v2774_v3 = vor.u32 %v3335_v43, %v2771_v45  ;;  %v3221_v45 = vld [vmem:[%s5248_s1 + $0x74] sm:$0xf] }
  0xb8   :  { %1921 = vmatpush.bf16.msrb.mxu0 %v2314_v16  ;;  %v4799_v5 = vpop.f32.mrf.mxu2  ;;  %v4805_v10 = vpop.f32.mrf.mxu0  ;;  %v2438_v16 = vor.u32 %v3251_v60, %v2435_v1  ;;  %v3178_v30 = vor.u32 %v3440_v28, %v3177_v24  ;;  %v3154_v60 = vor.u32 %v3434_v38, %v3153_v37  ;;  %v3129_v4 = vld [vmem:[%s5248_s1 + $0x6d0] sm:$0xf]  ;;  %v3105_v28 = vld [vmem:[%s5248_s1 + $0x6a0] sm:$0xf]  ;;  %v3269_v37 = vld [vmem:[%s5248_s1 + $0x1f4] sm:$0xf] }
  0xb9   :  { %1940 = vmatpush.bf16.msrb.mxu1 %v2506_v20  ;;  %v4803_v9 = vpop.f32.mrf.mxu3  ;;  %v2411_v20 = vld [vmem:[%s5248_s1 + $0x148] sm:$0xf0]  ;;  %v1584_v25 = vadd.f32 %v4665_v47, %v1565_v8  ;;  %v3416_v43 = vld [vmem:[%s5248_s1 + $0x684] sm:$0xf0] }
  0xba   :  { %1959 = vmatpush.bf16.msrb.mxu2 %v2698_v15  ;;  %v4813_v15 = vpop.f32.mrf.mxu1  ;;  %v2414_v31 = vor.u32 %v3245_v18, %v2411_v20  ;;  %v2363_v8 = vld [vmem:[%s5248_s1 + $0xe8] sm:$0xf0]  ;;  %v3422_v18 = vld [vmem:[%s5248_s1 + $0x6b4] sm:$0xf0]  ;;  %v3227_v20 = vld [vmem:[%s5248_s1 + $0xa4] sm:$0xf] }
  0xbb   :  { %1978 = vmatpush.bf16.msrb.mxu3 %v2890_v21  ;;  %v3341_v21 = vld [vmem:[%s5248_s1 + $0x434] sm:$0xf]  ;;  %v2507_v38 = vld [vmem:[%s5248_s1 + $0x208] sm:$0xf0] }
  0xbc   :  { %1922 = vmatpush.bf16.msrb.mxu0 %v2290_v35  ;;  %v2798_v33 = vor.u32 %v3341_v21, %v2795_v22  ;;  %v3287_v35 = vld [vmem:[%s5248_s1 + $0x284] sm:$0xf]  ;;  %v1570_v22 = vadd.f32 %v4745_v32, %v4734_v27 }
  0xbd   :  { %1941 = vmatpush.bf16.msrb.mxu1 %v2482_v39  ;;  %v3239_v39 = vld [vmem:[%s5248_s1 + $0x104] sm:$0xf]  ;;  %v2582_v59 = vor.u32 %v3287_v35, %v2579_v36  ;;  %v3106_v36 = vor.u32 %v3422_v18, %v3105_v28  ;;  %v3257_v18 = vld [vmem:[%s5248_s1 + $0x194] sm:$0xf] }
  0xbe   :  { %1960 = vmatpush.bf16.msrb.mxu2 %v2674_v34  ;;  %v4840_v34 = vperm.slane %v4836_v23, 0  ;;  %v2390_v1 = vor.u32 %v3239_v39, %v2387_v42  ;;  %v3081_v42 = vld [vmem:[%s5248_s1 + $0x670] sm:$0xf] }
  0xbf   :  { %1979 = vmatpush.bf16.msrb.mxu3 %v2866_v40  ;;  %v1603_v40 = vadd.f32 %v4676_v61, %v1584_v25  ;;  %v1567_v61 = vadd.f32 %v4689_v2, %v4678_v62  ;;  %v3428_v62 = vld [vmem:[%s5248_s1 + $0x6e4] sm:$0xf0]  ;;  %v3233_v2 = vld [vmem:[%s5248_s1 + $0xd4] sm:$0xf] }
  0xc0   :  { %1923 = vmatpush.bf16.msrb.mxu0 %v2266_v0  ;;  %v4848_v47 = vpop.f32.mrf.mxu2  ;;  %v1621_v49 = vpop.f32.mrf.mxu0  ;;  %v2555_v0 = vld [vmem:[%s5248_s1 + $0x268] sm:$0xf0]  ;;  %v3130_v13 = vor.u32 %v3428_v62, %v3129_v4  ;;  %v3057_v62 = vld [vmem:[%s5248_s1 + $0x640] sm:$0xf] }
  0xc1   :  { %1942 = vmatpush.bf16.msrb.mxu1 %v2458_v6  ;;  %v4860_v41 = vpop.f32.mrf.mxu3  ;;  %v1622_v55 = vadd.f32 %v1621_v49, %v1603_v40  ;;  %v1586_v6 = vadd.f32 %v4721_v19, %v1567_v61  ;;  %v1589_v49 = vadd.f32 %v4799_v5, %v1570_v22  ;;  %v2510_v5 = vor.u32 %v3269_v37, %v2507_v38  ;;  %v3404_v22 = vld [vmem:[%s5248_s1 + $0x624] sm:$0xf0] }
  0xc2   :  { %1961 = vmatpush.bf16.msrb.mxu2 %v2650_v63  ;;  %v4871_v52 = vpop.f32.mrf.mxu1  ;;  %v3281_v63 = vld [vmem:[%s5248_s1 + $0x254] sm:$0xf] }
  0xc3   :  { %1980 = vmatpush.bf16.msrb.mxu3 %v2842_v7  ;;  %v2195_v7 = vadd.f32 %v4840_v34, %v1622_v55  ;;  %1924 = vmatmul.bf16.vlgmr.msrb.gmra.mxu0 %v3720_v48  ;;  %v2558_v19 = vor.u32 %v3281_v63, %v2555_v0  ;;  %v1605_v21 = vadd.f32 %v4732_v26, %v1586_v6  ;;  %v2315_v55 = vld [vmem:[%s5248_s1 + $0x88] sm:$0xf0]  ;;  %v3263_v0 = vld [vmem:[%s5248_s1 + $0x1c4] sm:$0xf] }
  0xc4   :  { %1992 = vmatpush.bf16.msra.mxu0 %v3202_v12  ;;  %1943 = vmatmul.bf16.vlgmr.msrb.gmra.mxu1 %v3731_v53  ;;  %v2747_v12 = vld [vmem:[%s5248_s1 + $0x3e8] sm:$0xf0]  ;;  %v3082_v63 = vor.u32 %v3416_v43, %v3081_v42  ;;  %v3215_v6 = vld [vmem:[%s5248_s1 + $0x44] sm:$0xf] }
  0xc5   :  { %2011 = vmatpush.bf16.msra.mxu1 %v2438_v16  ;;  %1962 = vmatmul.bf16.vlgmr.msrb.gmra.mxu2 %v3733_v54  ;;  %2219 = vst [vmem:[%s5251_s3] sm:$0xff] %v2195_v7  ;;  %v2531_v16 = vld [vmem:[%s5248_s1 + $0x238] sm:$0xf0]  ;;  %v1608_v7 = vadd.f32 %v4803_v9, %v1589_v49 }
  0xc6   :  { %2030 = vmatpush.bf16.msra.mxu2 %v2630_v11  ;;  %v3329_v11 = vld [vmem:[%s5248_s1 + $0x3d4] sm:$0xf]  ;;  %1981 = vmatmul.bf16.vlgmr.msrb.gmra.mxu3 %v3741_v57  ;;  %v2534_v32 = vor.u32 %v3275_v14, %v2531_v16  ;;  %v1572_v14 = vadd.f32 %v4813_v15, %v4805_v10  ;;  %v3033_v15 = vld [vmem:[%s5248_s1 + $0x610] sm:$0xf] }
  0xc7   :  { %2049 = vmatpush.bf16.msra.mxu3 %v2822_v17  ;;  %v2366_v17 = vor.u32 %v3233_v2, %v2363_v8  ;;  %v2750_v24 = vor.u32 %v3329_v11, %v2747_v12  ;;  %v3410_v2 = vld [vmem:[%s5248_s1 + $0x654] sm:$0xf0]  ;;  %v2291_v12 = vld [vmem:[%s5248_s1 + $0x58] sm:$0xf0]  ;;  %v3034_v38 = vor.u32 %v3404_v22, %v3033_v15  ;;  %v3425_v15 = vld [vmem:[%s5248_s1 + $0x6d4] sm:$0xf] }
  0xc8   :  { %1993 = vmatpush.bf16.msra.mxu0 %v3178_v30  ;;  %v4926_v25 = vpop.f32.mrf.mxu2  ;;  %v2339_v30 = vld [vmem:[%s5248_s1 + $0xb8] sm:$0xf0]  ;;  %v1623_v26 = vpop.f32.mrf.mxu0  ;;  %v3058_v28 = vor.u32 %v3410_v2, %v3057_v62  ;;  %v3131_v22 = vld [vmem:[%s5248_s1 + $0x6e8] sm:$0xf0] }
  0xc9   :  { %2012 = vmatpush.bf16.msra.mxu1 %v2414_v31  ;;  %v3323_v31 = vld [vmem:[%s5248_s1 + $0x3a4] sm:$0xf]  ;;  %v1624_v27 = vadd.f32 %v1623_v26, %v1605_v21  ;;  %v2342_v39 = vor.u32 %v3227_v20, %v2339_v30  ;;  %v2459_v20 = vld [vmem:[%s5248_s1 + $0x1a8] sm:$0xf0]  ;;  %v2294_v21 = vor.u32 %v3215_v6, %v2291_v12  ;;  %v3209_v30 = vld [vmem:[%s5248_s1 + $0x14] sm:$0xf] }
  0xca   :  { %2031 = vmatpush.bf16.msra.mxu2 %v2606_v29  ;;  %v4928_v29 = vpop.f32.mrf.mxu3  ;;  %v4939_v35 = vpop.f32.mrf.mxu1  ;;  %v2267_v26 = vld [vmem:[%s5248_s1 + $0x28] sm:$0xf0]  ;;  %v2462_v37 = vor.u32 %v3257_v18, %v2459_v20  ;;  %v3377_v18 = vld [vmem:[%s5248_s1 + $0x554] sm:$0xf] }
  0xcb   :  { %2050 = vmatpush.bf16.msra.mxu3 %v2798_v33  ;;  %v2723_v33 = vld [vmem:[%s5248_s1 + $0x3b8] sm:$0xf0]  ;;  %v2201_v61 = vadd.f32 %v4840_v34, %v1624_v27  ;;  %v3305_v27 = vld [vmem:[%s5248_s1 + $0x314] sm:$0xf]  ;;  %v2270_v42 = vor.u32 %v3209_v30, %v2267_v26  ;;  %v2939_v20 = vld [vmem:[%s5248_s1 + $0x568] sm:$0xf0] }
  0xcc   :  { %1994 = vmatpush.bf16.msra.mxu0 %v3154_v60  ;;  %v2726_v40 = vor.u32 %v3323_v31, %v2723_v33  ;;  %v2699_v60 = vld [vmem:[%s5248_s1 + $0x388] sm:$0xf0]  ;;  %v1591_v31 = vadd.f32 %v4848_v47, %v1572_v14  ;;  %v3395_v47 = vld [vmem:[%s5248_s1 + $0x5e4] sm:$0xf] }
  0xcd   :  { %2013 = vmatpush.bf16.msra.mxu1 %v2390_v1  ;;  %2225 = vst [vmem:[%s5251_s3 + $0x30] sm:$0xff] %v2201_v61  ;;  %v2483_v1 = vld [vmem:[%s5248_s1 + $0x1d8] sm:$0xf0]  ;;  %v3419_v26 = vld [vmem:[%s5248_s1 + $0x6a4] sm:$0xf] }
  0xce   :  { %2032 = vmatpush.bf16.msra.mxu2 %v2582_v59  ;;  %v3317_v59 = vld [vmem:[%s5248_s1 + $0x374] sm:$0xf] }
  0xcf   :  { %2051 = vmatpush.bf16.msra.mxu3 %v2774_v3  ;;  %v2318_v3 = vor.u32 %v3221_v45, %v2315_v55  ;;  %v2702_v4 = vor.u32 %v3317_v59, %v2699_v60  ;;  %v1610_v45 = vadd.f32 %v4860_v41, %v1591_v31  ;;  %v3437_v41 = vld [vmem:[%s5248_s1 + $0x734] sm:$0xf]  ;;  %v2915_v31 = vld [vmem:[%s5248_s1 + $0x538] sm:$0xf0] }
  0xd0   :  { %1995 = vmatpush.bf16.msra.mxu0 %v3130_v13  ;;  %v4986_v8 = vpop.f32.mrf.mxu2  ;;  %v2675_v13 = vld [vmem:[%s5248_s1 + $0x358] sm:$0xf0]  ;;  %v1626_v9 = vpop.f32.mrf.mxu0 }
  0xd1   :  { %2014 = vmatpush.bf16.msra.mxu1 %v2366_v17  ;;  %v1627_v17 = vadd.f32 %v1626_v9, %v1608_v7  ;;  %v3383_v7 = vld [vmem:[%s5248_s1 + $0x584] sm:$0xf] }
  0xd2   :  { %2033 = vmatpush.bf16.msra.mxu2 %v2558_v19  ;;  %v4988_v11 = vpop.f32.mrf.mxu3  ;;  %v3311_v19 = vld [vmem:[%s5248_s1 + $0x344] sm:$0xf]  ;;  %v5001_v16 = vpop.f32.mrf.mxu1 }
  0xd3   :  { %2052 = vmatpush.bf16.msra.mxu3 %v2750_v24  ;;  %v2486_v24 = vor.u32 %v3263_v0, %v2483_v1  ;;  %v2678_v10 = vor.u32 %v3311_v19, %v2675_v13  ;;  %v2207_v33 = vadd.f32 %v4840_v34, %v1627_v17  ;;  %1929 = vmatmul.bf16.gmra.mxu0 %v3852_v44  ;;  %v2987_v0 = vld [vmem:[%s5248_s1 + $0x5c8] sm:$0xf0]  ;;  %v3431_v19 = vld [vmem:[%s5248_s1 + $0x704] sm:$0xf]  ;;  %v3155_v13 = vld [vmem:[%s5248_s1 + $0x718] sm:$0xf0] }
  0xd4   :  { %1996 = vmatpush.bf16.msra.mxu0 %v3106_v36  ;;  %1948 = vmatmul.bf16.gmra.mxu1 %v3863_v50  ;;  %v3011_v36 = vld [vmem:[%s5248_s1 + $0x5f8] sm:$0xf0] }
  0xd5   :  { %2015 = vmatpush.bf16.msra.mxu1 %v2342_v39  ;;  %1967 = vmatmul.bf16.gmra.mxu2 %v3865_v51  ;;  %2231 = vst [vmem:[%s5251_s3 + $0x60] sm:$0xff] %v2207_v33  ;;  %v3443_v39 = vld [vmem:[%s5248_s1 + $0x764] sm:$0xf]  ;;  %v3014_v55 = vor.u32 %v3395_v47, %v3011_v36 }
  0xd6   :  { %2034 = vmatpush.bf16.msra.mxu2 %v2534_v32  ;;  %v2651_v32 = vld [vmem:[%s5248_s1 + $0x328] sm:$0xf0]  ;;  %1986 = vmatmul.bf16.gmra.mxu3 %v3873_v56 }
  0xd7   :  { %2053 = vmatpush.bf16.msra.mxu3 %v2726_v40  ;;  %v3203_v40 = vld [vmem:[%s5248_s1 + $0x778] sm:$0xf0]  ;;  %v2654_v43 = vor.u32 %v3305_v27, %v2651_v32 }
  0xd8   :  { %1997 = vmatpush.bf16.msra.mxu0 %v3082_v63  ;;  %v5049_v49 = vpop.f32.mrf.mxu2  ;;  %v1628_v59 = vpop.f32.mrf.mxu0  ;;  %v3389_v63 = vld [vmem:[%s5248_s1 + $0x5b4] sm:$0xf]  ;;  %v3107_v27 = vld [vmem:[%s5248_s1 + $0x6b8] sm:$0xf0] }
  0xd9   :  { %2016 = vmatpush.bf16.msra.mxu1 %v2318_v3  ;;  %v1629_v1 = vadd.f32 %v1628_v59, %v1610_v45  ;;  %v3179_v3 = vld [vmem:[%s5248_s1 + $0x748] sm:$0xf0]  ;;  %v2990_v2 = vor.u32 %v3389_v63, %v2987_v0 }
  0xda   :  { %2035 = vmatpush.bf16.msra.mxu2 %v2510_v5  ;;  %v5051_v61 = vpop.f32.mrf.mxu3  ;;  %v5053_v60 = vpop.f32.mrf.mxu1  ;;  %v3206_v5 = vor.u32 %v3443_v39, %v3203_v40  ;;  %v3182_v6 = vor.u32 %v3437_v41, %v3179_v3  ;;  %v2891_v39 = vld [vmem:[%s5248_s1 + $0x508] sm:$0xf0]  ;;  %v1665_v40 = vadd.f32 %v5049_v49, %v5001_v16  ;;  %v3359_v16 = vld [vmem:[%s5248_s1 + $0x4c4] sm:$0xf]  ;;  %v2867_v49 = vld [vmem:[%s5248_s1 + $0x4d8] sm:$0xf0] }
  0xdb   :  { %2054 = vmatpush.bf16.msra.mxu3 %v2702_v4  ;;  %v1660_v4 = vadd.f32 %v4926_v25, %v4871_v52  ;;  %v2213_v62 = vadd.f32 %v4840_v34, %v1629_v1  ;;  %v2963_v52 = vld [vmem:[%s5248_s1 + $0x598] sm:$0xf0]  ;;  %v3083_v45 = vld [vmem:[%s5248_s1 + $0x688] sm:$0xf0]  ;;  %v3407_v41 = vld [vmem:[%s5248_s1 + $0x644] sm:$0xf] }
  0xdc   :  { %1998 = vmatpush.bf16.msra.mxu0 %v3058_v28  ;;  %v3158_v28 = vor.u32 %v3431_v19, %v3155_v13  ;;  %v1684_v63 = vadd.f32 %v5051_v61, %v1665_v40  ;;  %v3059_v3 = vld [vmem:[%s5248_s1 + $0x658] sm:$0xf0]  ;;  %v2870_v61 = vor.u32 %v3359_v16, %v2867_v49  ;;  %v3401_v13 = vld [vmem:[%s5248_s1 + $0x614] sm:$0xf] }
  0xdd   :  { %2017 = vmatpush.bf16.msra.mxu1 %v2294_v21  ;;  %2237 = vst [vmem:[%s5251_s3 + $0x90] sm:$0xff] %v2213_v62  ;;  %v1679_v34 = vadd.f32 %v4928_v29, %v1660_v4  ;;  %v5091_v29 = vperm.slane %v4836_v23, 1  ;;  %v1662_v21 = vadd.f32 %v4986_v8, %v4939_v35  ;;  %v2942_v35 = vor.u32 %v3377_v18, %v2939_v20  ;;  %v3371_v8 = vld [vmem:[%s5248_s1 + $0x524] sm:$0xf] }
  0xde   :  { %2036 = vmatpush.bf16.msra.mxu2 %v2486_v24  ;;  %v2966_v24 = vor.u32 %v3383_v7, %v2963_v52  ;;  %v3353_v7 = vld [vmem:[%s5248_s1 + $0x494] sm:$0xf]  ;;  %v2843_v52 = vld [vmem:[%s5248_s1 + $0x4a8] sm:$0xf0] }
  0xdf   :  { %2055 = vmatpush.bf16.msra.mxu3 %v2678_v10 }
  0xe0   :  { %1999 = vmatpush.bf16.msra.mxu0 %v3034_v38  ;;  %v5080_v25 = vpop.f32.mrf.mxu2  ;;  %v1697_v14 = vpop.f32.mrf.mxu0  ;;  %v3365_v38 = vld [vmem:[%s5248_s1 + $0x4f4] sm:$0xf] }
  0xe1   :  { %2018 = vmatpush.bf16.msra.mxu1 %v2270_v42  ;;  %v1698_v17 = vadd.f32 %v1697_v14, %v1679_v34  ;;  %v2894_v59 = vor.u32 %v3365_v38, %v2891_v39  ;;  %v1667_v34 = vadd.f32 %v5080_v25, %v5053_v60  ;;  %v3035_v14 = vld [vmem:[%s5248_s1 + $0x628] sm:$0xf0]  ;;  %v2846_v60 = vor.u32 %v3353_v7, %v2843_v52 }
  0xe2   :  { %2037 = vmatpush.bf16.msra.mxu2 %v2462_v37  ;;  %v5082_v12 = vpop.f32.mrf.mxu3  ;;  %v1716_v9 = vpop.f32.mrf.mxu1  ;;  %v3110_v37 = vor.u32 %v3419_v26, %v3107_v27  ;;  %v2186_v7 = vperm.slane %v4836_v23, 3 }
  0xe3   :  { %2056 = vmatpush.bf16.msra.mxu3 %v2654_v43  ;;  %v1717_v10 = vadd.f32 %v1716_v9, %v1698_v17  ;;  %2000 = vmatmul.bf16.vlgmr.msra.gmra.mxu0 %v3990_v58  ;;  %v3413_v43 = vld [vmem:[%s5248_s1 + $0x674] sm:$0xf]  ;;  %v1686_v25 = vadd.f32 %v5082_v12, %v1667_v34 }
  0xe4   :  { %2068 = vmatpush.bf16.msrb.mxu0 %v3014_v55  ;;  %2019 = vmatmul.bf16.vlgmr.msra.gmra.mxu1 %v3720_v48  ;;  %v3134_v48 = vor.u32 %v3425_v15, %v3131_v22 }
  0xe5   :  { %2087 = vmatpush.bf16.msrb.mxu1 %v3206_v5  ;;  %2038 = vmatmul.bf16.vlgmr.msra.gmra.mxu2 %v3731_v53  ;;  %v2196_v30 = vadd.f32 %v5091_v29, %v1717_v10  ;;  %v1681_v53 = vadd.f32 %v4988_v11, %v1662_v21  ;;  %v2918_v11 = vor.u32 %v3371_v8, %v2915_v31 }
  0xe6   :  { %3447 = vmatpush.bf16.msrb.mxu2 %v3014_v55  ;;  %2057 = vmatmul.bf16.vlgmr.msra.gmra.mxu3 %v3733_v54 }
  0xe7   :  { %3455 = vmatpush.bf16.msrb.mxu3 %v3206_v5  ;;  %2220 = vst [vmem:[%s5251_s3 + $0x8] sm:$0xff] %v2196_v30  ;;  %v3086_v5 = vor.u32 %v3413_v43, %v3083_v45 }
  0xe8   :  { %2069 = vmatpush.bf16.msrb.mxu0 %v2990_v2  ;;  %v5122_v54 = vpop.f32.mrf.mxu2  ;;  %v1699_v32 = vpop.f32.mrf.mxu0 }
  0xe9   :  { %2088 = vmatpush.bf16.msrb.mxu1 %v3182_v6  ;;  %v1700_v36 = vadd.f32 %v1699_v32, %v1681_v53 }
  0xea   :  { %3448 = vmatpush.bf16.msrb.mxu2 %v2990_v2  ;;  %v5124_v33 = vpop.f32.mrf.mxu3  ;;  %v1718_v47 = vpop.f32.mrf.mxu1 }
  0xeb   :  { %3456 = vmatpush.bf16.msrb.mxu3 %v3182_v6  ;;  %v1719_v42 = vadd.f32 %v1718_v47, %v1700_v36  ;;  %v3062_v6 = vor.u32 %v3407_v41, %v3059_v3  ;;  %v1755_v10 = vadd.f32 %v5124_v33, %v5122_v54 }
  0xec   :  { %2070 = vmatpush.bf16.msrb.mxu0 %v2966_v24 }
  0xed   :  { %2089 = vmatpush.bf16.msrb.mxu1 %v3158_v28  ;;  %v2202_v55 = vadd.f32 %v5091_v29, %v1719_v42 }
  0xee   :  { %3449 = vmatpush.bf16.msrb.mxu2 %v2966_v24 }
  0xef   :  { %3457 = vmatpush.bf16.msrb.mxu3 %v3158_v28  ;;  %2226 = vst [vmem:[%s5251_s3 + $0x38] sm:$0xff] %v2202_v55 }
  0xf0   :  { %2071 = vmatpush.bf16.msrb.mxu0 %v2942_v35  ;;  %v1737_v0 = vpop.f32.mrf.mxu2  ;;  %v1702_v4 = vpop.f32.mrf.mxu0 }
  0xf1   :  { %2090 = vmatpush.bf16.msrb.mxu1 %v3134_v48  ;;  %v1703_v2 = vadd.f32 %v1702_v4, %v1684_v63 }
  0xf2   :  { %3450 = vmatpush.bf16.msrb.mxu2 %v2942_v35  ;;  %v1756_v1 = vpop.f32.mrf.mxu3  ;;  %v1721_v62 = vpop.f32.mrf.mxu1  ;;  %v2185_v35 = vperm.slane %v4836_v23, 2 }
  0xf3   :  { %3458 = vmatpush.bf16.msrb.mxu3 %v3134_v48  ;;  %v1722_v19 = vadd.f32 %v1721_v62, %v1703_v2  ;;  %2005 = vmatmul.bf16.gmra.mxu0 %v4098_v46  ;;  %v1757_v31 = vadd.f32 %v1756_v1, %v1737_v0 }
  0xf4   :  { %2072 = vmatpush.bf16.msrb.mxu0 %v2918_v11  ;;  %2024 = vmatmul.bf16.gmra.mxu1 %v3852_v44  ;;  %v3038_v44 = vor.u32 %v3401_v13, %v3035_v14 }
  0xf5   :  { %2091 = vmatpush.bf16.msrb.mxu1 %v3110_v37  ;;  %2043 = vmatmul.bf16.gmra.mxu2 %v3863_v50  ;;  %v2208_v9 = vadd.f32 %v5091_v29, %v1722_v19 }
  0xf6   :  { %3451 = vmatpush.bf16.msrb.mxu2 %v2918_v11  ;;  %2062 = vmatmul.bf16.gmra.mxu3 %v3865_v51 }
  0xf7   :  { %3459 = vmatpush.bf16.msrb.mxu3 %v3110_v37  ;;  %2232 = vst [vmem:[%s5251_s3 + $0x68] sm:$0xff] %v2208_v9 }
  0xf8   :  { %2073 = vmatpush.bf16.msrb.mxu0 %v2894_v59  ;;  %v1740_v17 = vpop.f32.mrf.mxu2  ;;  %v1704_v28 = vpop.f32.mrf.mxu0 }
  0xf9   :  { %2092 = vmatpush.bf16.msrb.mxu1 %v3086_v5  ;;  %v1705_v18 = vadd.f32 %v1704_v28, %v1686_v25 }
  0xfa   :  { %3452 = vmatpush.bf16.msrb.mxu2 %v2894_v59  ;;  %v1759_v24 = vpop.f32.mrf.mxu3  ;;  %v1723_v50 = vpop.f32.mrf.mxu1 }
  0xfb   :  { %3460 = vmatpush.bf16.msrb.mxu3 %v3086_v5  ;;  %v1724_v51 = vadd.f32 %v1723_v50, %v1705_v18  ;;  %v1760_v32 = vadd.f32 %v1759_v24, %v1740_v17 }
  0xfc   :  { %2074 = vmatpush.bf16.msrb.mxu0 %v2870_v61 }
  0xfd   :  { %2093 = vmatpush.bf16.msrb.mxu1 %v3062_v6  ;;  %v2214_v20 = vadd.f32 %v5091_v29, %v1724_v51 }
  0xfe   :  { %3453 = vmatpush.bf16.msrb.mxu2 %v2870_v61 }
  0xff   :  { %3461 = vmatpush.bf16.msrb.mxu3 %v3062_v6  ;;  %2238 = vst [vmem:[%s5251_s3 + $0x98] sm:$0xff] %v2214_v20 }
 0x100   :  { %2075 = vmatpush.bf16.msrb.mxu0 %v2846_v60  ;;  %v1742_v12 = vpop.f32.mrf.mxu2  ;;  %v1773_v15 = vpop.f32.mrf.mxu0 }
 0x101   :  { %2094 = vmatpush.bf16.msrb.mxu1 %v3038_v44  ;;  %v1774_v30 = vadd.f32 %v1773_v15, %v1755_v10 }
 0x102   :  { %3454 = vmatpush.bf16.msrb.mxu2 %v2846_v60  ;;  %v1761_v21 = vpop.f32.mrf.mxu3  ;;  %v1792_v22 = vpop.f32.mrf.mxu1 }
 0x103   :  { %3462 = vmatpush.bf16.msrb.mxu3 %v3038_v44  ;;  %2076 = vmatmul.bf16.vlgmr.msrb.gmra.mxu0 %v3741_v57  ;;  %v1793_v29 = vadd.f32 %v1792_v22, %v1774_v30  ;;  %v1762_v42 = vadd.f32 %v1761_v21, %v1742_v12 }
 0x104   :  { %2095 = vmatmul.bf16.vlgmr.msrb.gmra.mxu1 %v3990_v58 }
 0x105   :  { %2081 = vmatmul.bf16.vlgmr.msrb.gmra.mxu2 %v3873_v56 }
 0x106   :  { %2100 = vmatmul.bf16.vlgmr.msrb.gmra.mxu3 %v4098_v46 }
 0x108   :  { %v1811_v48 = vpop.f32.mrf.mxu2  ;;  %v1775_v26 = vpop.f32.mrf.mxu0 }
 0x109   :  { %v1812_v53 = vadd.f32 %v1811_v48, %v1793_v29  ;;  %v1776_v27 = vadd.f32 %v1775_v26, %v1757_v31 }
 0x10a   :  { %v1830_v8 = vpop.f32.mrf.mxu3  ;;  %v1794_v54 = vpop.f32.mrf.mxu1 }
 0x10b   :  { %v2197_v33 = vadd.f32 %v2185_v35, %v1812_v53  ;;  %v1795_v57 = vadd.f32 %v1794_v54, %v1776_v27 }
 0x10d   :  { %2221 = vst [vmem:[%s5251_s3 + $0x10] sm:$0xff] %v2197_v33 }
 0x110   :  { %v1813_v58 = vpop.f32.mrf.mxu2  ;;  %v1778_v47 = vpop.f32.mrf.mxu0 }
 0x111   :  { %v1814_v46 = vadd.f32 %v1813_v58, %v1795_v57  ;;  %v1779_v37 = vadd.f32 %v1778_v47, %v1760_v32 }
 0x112   :  { %v1832_v56 = vpop.f32.mrf.mxu3  ;;  %v1797_v36 = vpop.f32.mrf.mxu1 }
 0x113   :  { %v2203_v11 = vadd.f32 %v2185_v35, %v1814_v46  ;;  %v1798_v38 = vadd.f32 %v1797_v36, %v1779_v37 }
 0x115   :  { %2227 = vst [vmem:[%s5251_s3 + $0x40] sm:$0xff] %v2203_v11 }
 0x118   :  { %v1816_v39 = vpop.f32.mrf.mxu2  ;;  %v1780_v45 = vpop.f32.mrf.mxu0 }
 0x119   :  { %v1817_v43 = vadd.f32 %v1816_v39, %v1798_v38  ;;  %v1781_v5 = vadd.f32 %v1780_v45, %v1762_v42 }
 0x11a   :  { %v1835_v40 = vpop.f32.mrf.mxu3  ;;  %v1799_v55 = vpop.f32.mrf.mxu1 }
 0x11b   :  { %v2209_v59 = vadd.f32 %v2185_v35, %v1817_v43  ;;  %v1800_v16 = vadd.f32 %v1799_v55, %v1781_v5 }
 0x11d   :  { %2233 = vst [vmem:[%s5251_s3 + $0x70] sm:$0xff] %v2209_v59  ;;  %v2187_v59 = vperm.slane %v4836_v23, 4 }
 0x120   :  { %v1818_v49 = vpop.f32.mrf.mxu2  ;;  %v1849_v1 = vpop.f32.mrf.mxu0 }
 0x121   :  { %v1819_v0 = vadd.f32 %v1818_v49, %v1800_v16  ;;  %v1850_v4 = vadd.f32 %v1849_v1, %v1830_v8 }
 0x122   :  { %v1837_v63 = vpop.f32.mrf.mxu3  ;;  %v1868_v41 = vpop.f32.mrf.mxu1 }
 0x123   :  { %v2215_v3 = vadd.f32 %v2185_v35, %v1819_v0  ;;  %v1869_v62 = vadd.f32 %v1868_v41, %v1850_v4 }
 0x125   :  { %2239 = vst [vmem:[%s5251_s3 + $0xa0] sm:$0xff] %v2215_v3 }
 0x128   :  { %v1887_v2 = vpop.f32.mrf.mxu2  ;;  %v1851_v52 = vpop.f32.mrf.mxu0 }
 0x129   :  { %v1888_v6 = vadd.f32 %v1887_v2, %v1869_v62  ;;  %v1852_v13 = vadd.f32 %v1851_v52, %v1832_v56 }
 0x12a   :  { %v1906_v61 = vpop.f32.mrf.mxu3  ;;  %v1870_v34 = vpop.f32.mrf.mxu1 }
 0x12b   :  { %v1907_v19 = vadd.f32 %v1906_v61, %v1888_v6  ;;  %v1871_v9 = vadd.f32 %v1870_v34, %v1852_v13 }
 0x12d   :  { %v2198_v14 = vadd.f32 %v2186_v7, %v1907_v19 }
 0x12f   :  { %2222 = vst [vmem:[%s5251_s3 + $0x18] sm:$0xff] %v2198_v14 }
 0x130   :  { %v1889_v60 = vpop.f32.mrf.mxu2  ;;  %v1854_v17 = vpop.f32.mrf.mxu0 }
 0x131   :  { %v1890_v25 = vadd.f32 %v1889_v60, %v1871_v9  ;;  %v1855_v50 = vadd.f32 %v1854_v17, %v1835_v40 }
 0x132   :  { %v1908_v44 = vpop.f32.mrf.mxu3  ;;  %v1873_v24 = vpop.f32.mrf.mxu1 }
 0x133   :  { %v1909_v28 = vadd.f32 %v1908_v44, %v1890_v25  ;;  %v1874_v51 = vadd.f32 %v1873_v24, %v1855_v50 }
 0x135   :  { %v2204_v18 = vadd.f32 %v2186_v7, %v1909_v28 }
 0x137   :  { %2228 = vst [vmem:[%s5251_s3 + $0x48] sm:$0xff] %v2204_v18 }
 0x138   :  { %v1892_v20 = vpop.f32.mrf.mxu2  ;;  %v1856_v10 = vpop.f32.mrf.mxu0 }
 0x139   :  { %v1893_v21 = vadd.f32 %v1892_v20, %v1874_v51  ;;  %v1857_v30 = vadd.f32 %v1856_v10, %v1837_v63 }
 0x13a   :  { %v1911_v12 = vpop.f32.mrf.mxu3  ;;  %v1875_v15 = vpop.f32.mrf.mxu1 }
 0x13b   :  { %v1912_v22 = vadd.f32 %v1911_v12, %v1893_v21  ;;  %v1876_v35 = vadd.f32 %v1875_v15, %v1857_v30 }
 0x13d   :  { %v2210_v29 = vadd.f32 %v2186_v7, %v1912_v22 }
 0x13f   :  { %2234 = vst [vmem:[%s5251_s3 + $0x78] sm:$0xff] %v2210_v29 }
 0x140   :  { %v1894_v48 = vpop.f32.mrf.mxu2  ;;  %v1925_v53 = vpop.f32.mrf.mxu0 }
 0x141   :  { %v1895_v31 = vadd.f32 %v1894_v48, %v1876_v35  ;;  %v2188_v48 = vperm.slane %v4836_v23, 5 }
 0x142   :  { %v1913_v8 = vpop.f32.mrf.mxu3  ;;  %v1944_v26 = vpop.f32.mrf.mxu1 }
 0x143   :  { %v1914_v54 = vadd.f32 %v1913_v8, %v1895_v31  ;;  %v1945_v11 = vadd.f32 %v1944_v26, %v1925_v53 }
 0x145   :  { %v2216_v33 = vadd.f32 %v2186_v7, %v1914_v54 }
 0x147   :  { %2240 = vst [vmem:[%s5251_s3 + $0xa8] sm:$0xff] %v2216_v33 }
 0x148   :  { %v1963_v27 = vpop.f32.mrf.mxu2  ;;  %v1927_v58 = vpop.f32.mrf.mxu0 }
 0x149   :  { %v1964_v42 = vadd.f32 %v1963_v27, %v1945_v11 }
 0x14a   :  { %v1982_v57 = vpop.f32.mrf.mxu3  ;;  %v1946_v56 = vpop.f32.mrf.mxu1 }
 0x14b   :  { %v1983_v43 = vadd.f32 %v1982_v57, %v1964_v42  ;;  %v1947_v49 = vadd.f32 %v1946_v56, %v1927_v58 }
 0x150   :  { %v1965_v32 = vpop.f32.mrf.mxu2  ;;  %v1930_v47 = vpop.f32.mrf.mxu0 }
 0x151   :  { %v1966_v0 = vadd.f32 %v1965_v32, %v1947_v49 }
 0x152   :  { %v1984_v46 = vpop.f32.mrf.mxu3  ;;  %v1949_v36 = vpop.f32.mrf.mxu1 }
 0x153   :  { %v1985_v41 = vadd.f32 %v1984_v46, %v1966_v0  ;;  %v1950_v3 = vadd.f32 %v1949_v36, %v1930_v47 }
 0x158   :  { %v1968_v37 = vpop.f32.mrf.mxu2  ;;  %v1932_v39 = vpop.f32.mrf.mxu0 }
 0x159   :  { %v1969_v7 = vadd.f32 %v1968_v37, %v1950_v3 }
 0x15a   :  { %v1987_v38 = vpop.f32.mrf.mxu3  ;;  %v1951_v40 = vpop.f32.mrf.mxu1 }
 0x15b   :  { %v1988_v34 = vadd.f32 %v1987_v38, %v1969_v7  ;;  %v1952_v60 = vadd.f32 %v1951_v40, %v1932_v39 }
 0x160   :  { %v1970_v45 = vpop.f32.mrf.mxu2  ;;  %v2001_v5 = vpop.f32.mrf.mxu0 }
 0x161   :  { %v2002_v63 = vadd.f32 %v2001_v5, %v1983_v43  ;;  %v1971_v25 = vadd.f32 %v1970_v45, %v1952_v60 }
 0x162   :  { %v1989_v55 = vpop.f32.mrf.mxu3  ;;  %v2020_v16 = vpop.f32.mrf.mxu1 }
 0x163   :  { %v2199_v1 = vadd.f32 %v2187_v59, %v2002_v63  ;;  %v1990_v24 = vadd.f32 %v1989_v55, %v1971_v25 }
 0x165   :  { %2223 = vst [vmem:[%s5251_s3 + $0x20] sm:$0xff] %v2199_v1 }
 0x168   :  { %v2039_v4 = vpop.f32.mrf.mxu2  ;;  %v2003_v2 = vpop.f32.mrf.mxu0 }
 0x169   :  { %v2004_v6 = vadd.f32 %v2003_v2, %v1985_v41  ;;  %v2040_v12 = vadd.f32 %v2039_v4, %v2020_v16 }
 0x16a   :  { %v2058_v62 = vpop.f32.mrf.mxu3  ;;  %v2022_v61 = vpop.f32.mrf.mxu1 }
 0x16b   :  { %v2205_v52 = vadd.f32 %v2187_v59, %v2004_v6  ;;  %v2059_v10 = vadd.f32 %v2058_v62, %v2040_v12 }
 0x16d   :  { %2229 = vst [vmem:[%s5251_s3 + $0x50] sm:$0xff] %v2205_v52 }
 0x170   :  { %v2041_v19 = vpop.f32.mrf.mxu2  ;;  %v2006_v14 = vpop.f32.mrf.mxu0 }
 0x171   :  { %v2007_v44 = vadd.f32 %v2006_v14, %v1988_v34  ;;  %v2042_v31 = vadd.f32 %v2041_v19, %v2022_v61 }
 0x172   :  { %v2060_v13 = vpop.f32.mrf.mxu3  ;;  %v2025_v9 = vpop.f32.mrf.mxu1 }
 0x173   :  { %v2211_v17 = vadd.f32 %v2187_v59, %v2007_v44  ;;  %v2061_v33 = vadd.f32 %v2060_v13, %v2042_v31 }
 0x175   :  { %2235 = vst [vmem:[%s5251_s3 + $0x80] sm:$0xff] %v2211_v17 }
 0x178   :  { %v2044_v28 = vpop.f32.mrf.mxu2  ;;  %v2008_v18 = vpop.f32.mrf.mxu0 }
 0x179   :  { %v2009_v20 = vadd.f32 %v2008_v18, %v1990_v24  ;;  %v2045_v8 = vadd.f32 %v2044_v28, %v2025_v9 }
 0x17a   :  { %v2063_v50 = vpop.f32.mrf.mxu3  ;;  %v2027_v51 = vpop.f32.mrf.mxu1 }
 0x17b   :  { %v2217_v21 = vadd.f32 %v2187_v59, %v2009_v20  ;;  %v2064_v54 = vadd.f32 %v2063_v50, %v2045_v8 }
 0x17d   :  { %2241 = vst [vmem:[%s5251_s3 + $0xb0] sm:$0xff] %v2217_v21 }
 0x180   :  { %v2046_v15 = vpop.f32.mrf.mxu2  ;;  %v2077_v30 = vpop.f32.mrf.mxu0 }
 0x181   :  { %v2078_v35 = vadd.f32 %v2077_v30, %v2059_v10  ;;  %v2047_v46 = vadd.f32 %v2046_v15, %v2027_v51 }
 0x182   :  { %v2065_v22 = vpop.f32.mrf.mxu3  ;;  %v2096_v29 = vpop.f32.mrf.mxu1 }
 0x183   :  { %v2097_v53 = vadd.f32 %v2096_v29, %v2078_v35  ;;  %v2066_v38 = vadd.f32 %v2065_v22, %v2047_v46 }
 0x185   :  { %v2200_v26 = vadd.f32 %v2188_v48, %v2097_v53 }
 0x187   :  { %2224 = vst [vmem:[%s5251_s3 + $0x28] sm:$0xff] %v2200_v26 }
 0x188   :  { %v2082_v27 = vpop.f32.mrf.mxu2  ;;  %v2079_v56 = vpop.f32.mrf.mxu0 }
 0x189   :  { %v2083_v58 = vadd.f32 %v2082_v27, %v2064_v54  ;;  %v2080_v32 = vadd.f32 %v2079_v56, %v2061_v33 }
 0x18a   :  { %v2101_v57 = vpop.f32.mrf.mxu3  ;;  %v2098_v36 = vpop.f32.mrf.mxu1 }
 0x18b   :  { %v2102_v47 = vadd.f32 %v2101_v57, %v2083_v58  ;;  %v2099_v11 = vadd.f32 %v2098_v36, %v2080_v32 }
 0x18d   :  { %v2212_v23 = vadd.f32 %v2188_v48, %v2102_v47  ;;  %v2206_v37 = vadd.f32 %v2188_v48, %v2099_v11 }
 0x18f   :  { %2236 = vst [vmem:[%s5251_s3 + $0x88] sm:$0xff] %v2212_v23 }
 0x190   :  { %2230 = vst [vmem:[%s5251_s3 + $0x58] sm:$0xff] %v2206_v37  ;;  %v2084_v39 = vpop.f32.mrf.mxu2 }
 0x191   :  { %v2085_v40 = vadd.f32 %v2084_v39, %v2066_v38 }
 0x192   :  { %v2103_v42 = vpop.f32.mrf.mxu3 }
 0x193   :  { %v2104_v43 = vadd.f32 %v2103_v42, %v2085_v40 }
 0x195   :  { %v2218_v45 = vadd.f32 %v2188_v48, %v2104_v43 }
 0x197   :  { %2242 = vst [vmem:[%s5251_s3 + $0xb8] sm:$0xff] %v2218_v45 }

</bundles_post_ra>
